<compile_context>
chip_gen: v5e
topology: v5e:2x2
jax: 0.10.0
libtpu: 0.0.40
codegen_flags: <defaults>
</compile_context>

<pallas_src>
import math

import numpy as np
import jax
import jax.numpy as jnp
from jax.experimental import pallas as pl
from jax.experimental.pallas import tpu as pltpu

# ---------------------------------------------------------------------------
# Small synthetic config (mirrors `opts`)
# ---------------------------------------------------------------------------
PAD = 0                      # data.SPECIAL_TOKENS['<pad>']
B, L, LS = 2, 8, 8           # batch, target len, encoder len
D_MODEL = 32                 # opts.emb_size
D_INNER = 64                 # opts.hidden_size
N_HEAD = 2                   # opts.n_head
D_K = D_V = 16               # opts.d_k / opts.d_v
VOCAB = 16                   # opts.vocab_size
OUT_SIZE = 10                # opts.output_size
N_LAYERS = 2                 # opts.n_layers
LN_EPS = 1e-5
NEG_INF = -1e30
BF16 = jnp.bfloat16
SCALE = 1.0 / math.sqrt(D_K)     # folded into packed Q weights/biases

HK = N_HEAD * D_K            # 32
HV = N_HEAD * D_V            # 32
VEC_W = 128                  # lane-padded width of the packed bias/gain rows
OUT_PAD = 128                # lane-dense padded width of the projection

# packed per-layer vector-row indices
(V_BQKV_S, V_BO_S, V_G1, V_BE1,
 V_BQ_E, V_BKV_E, V_BO_E, V_G2, V_BE2,
 V_BF1, V_BF2, V_G3, V_BE3) = range(13)
N_VEC = 13


# ---------------------------------------------------------------------------
# Shared math helpers (used inside the Pallas kernel and by the reference)
# ---------------------------------------------------------------------------
def _mm(a, b):
    """bf16 x bf16 matmul with f32 accumulation (native MXU path)."""
    return jnp.dot(a.astype(BF16), b.astype(BF16),
                   preferred_element_type=jnp.float32)


def _ln(v, g, b):
    mu = jnp.mean(v, axis=-1, keepdims=True)
    var = jnp.mean(jnp.square(v - mu), axis=-1, keepdims=True)
    return (v - mu) * jax.lax.rsqrt(var + LN_EPS) * g + b


# ---------------------------------------------------------------------------
# Fused decoder kernel
# ---------------------------------------------------------------------------
def _attn_core(q, k, v, bias):
    """q:(B,Lq,H*dk)  k:(B,Lk,H*dk)  v:(B,Lk,H*dv)  bias:(B,Lq,Lk) f32 or None.
    Softmax scale is pre-folded into q.  Returns (B*Lq, H*dv) f32."""
    lq = q.shape[1]
    heads = []
    for h in range(N_HEAD):                      # tiny static unroll (H=2)
        qh = q[:, :, h * D_K:(h + 1) * D_K].astype(BF16)
        kh = k[:, :, h * D_K:(h + 1) * D_K].astype(BF16)
        vh = v[:, :, h * D_V:(h + 1) * D_V].astype(BF16)
        # batched Q @ K^T (contracting-last, no transpose), batch dim = B
        s = jnp.einsum('bqd,bkd->bqk', qh, kh,
                       preferred_element_type=jnp.float32)
        if bias is not None:
            s = s + bias                          # additive mask (hoisted, f32)
        s = s - jnp.max(s, axis=-1, keepdims=True)
        p = jnp.exp(s)
        p = p * pl.reciprocal(jnp.sum(p, axis=-1, keepdims=True), approx=True)
        heads.append(jnp.einsum('bqk,bkd->bqd', p.astype(BF16), vh,
                                preferred_element_type=jnp.float32))
    ctx = jnp.concatenate(heads, axis=-1)         # (B, Lq, H*dv), lane concat
    return ctx.reshape(B * lq, HV)                # merge leading dims (free)


def fused_decoder_kernel(x_ref, enc_ref, npad_ref, bias_ref,
                         wqkv_s_ref, wo_s_ref, wq_e_ref, wkv_e_ref, wo_e_ref,
                         w1_ref, w2_ref, vec_ref, wprj_ref, out_ref):
    x = x_ref[...]            # (B*L, D)   decoder activations, VMEM-resident
    enc = enc_ref[...]        # (B*LS, D)
    npad = npad_ref[...]      # (B*L, 1)   non-pad mask
    bias = bias_ref[...]      # (B, L, L)  additive self-attn mask (hoisted)

    for l in range(N_LAYERS):                     # static unroll (N_LAYERS=2)
        vec = vec_ref[l]                          # (N_VEC, 128) biases/gains

        # ---- masked self-attention + residual + LN + non-pad mask ---------
        qkv = _mm(x, wqkv_s_ref[l]) + vec[V_BQKV_S:V_BQKV_S + 1, :2 * HK + HV]
        q = qkv[:, :HK].reshape(B, L, HK)
        k = qkv[:, HK:2 * HK].reshape(B, L, HK)
        v = qkv[:, 2 * HK:2 * HK + HV].reshape(B, L, HV)
        ctx = _attn_core(q, k, v, bias)
        attn = _mm(ctx, wo_s_ref[l]) + vec[V_BO_S:V_BO_S + 1, :D_MODEL]
        x = _ln(attn + x,
                vec[V_G1:V_G1 + 1, :D_MODEL],
                vec[V_BE1:V_BE1 + 1, :D_MODEL]) * npad

        # ---- encoder-decoder attention (dec_enc_attn_mask is None) --------
        q = (_mm(x, wq_e_ref[l])
             + vec[V_BQ_E:V_BQ_E + 1, :HK]).reshape(B, L, HK)
        kv = _mm(enc, wkv_e_ref[l]) + vec[V_BKV_E:V_BKV_E + 1, :HK + HV]
        k = kv[:, :HK].reshape(B, LS, HK)
        v = kv[:, HK:HK + HV].reshape(B, LS, HV)
        ctx = _attn_core(q, k, v, None)
        attn = _mm(ctx, wo_e_ref[l]) + vec[V_BO_E:V_BO_E + 1, :D_MODEL]
        x = _ln(attn + x,
                vec[V_G2:V_G2 + 1, :D_MODEL],
                vec[V_BE2:V_BE2 + 1, :D_MODEL]) * npad

        # ---- position-wise FFN (Conv1d k=1 == matmul) ----------------------
        h = jnp.maximum(_mm(x, w1_ref[l]) + vec[V_BF1:V_BF1 + 1, :D_INNER], 0.0)
        f = _mm(h, w2_ref[l]) + vec[V_BF2:V_BF2 + 1, :D_MODEL]
        x = _ln(f + x,
                vec[V_G3:V_G3 + 1, :D_MODEL],
                vec[V_BE3:V_BE3 + 1, :D_MODEL]) * npad

    # ---- lane-dense epilogue: project ALL rows through padded wprj ---------
    # (extra rows of a 16x32x128 matmul are ~free on the MXU; row-0 selection
    #  and lane un-padding happen in the JAX wrapper -> unmasked vst here.)
    out_ref[...] = _mm(x, wprj_ref[...])          # (B*L, OUT_PAD)


def _vmem_spec():
    return pl.BlockSpec(memory_space=pltpu.MemorySpace.VMEM)


def _flop_estimate():
    m, me = B * L, B * LS
    per_layer = (
        2 * m * D_MODEL * (2 * HK + HV)                       # fused QKV proj
        + 2 * m * HV * D_MODEL                                # self out-proj
        + 2 * m * D_MODEL * HK + 2 * me * D_MODEL * (HK + HV)  # enc q / kv
        + 2 * m * HV * D_MODEL                                # enc out-proj
        + 2 * B * N_HEAD * (L * L + L * LS) * (D_K + D_V)     # attention dots
        + 2 * m * D_MODEL * D_INNER + 2 * m * D_INNER * D_MODEL)  # FFN
    flops = N_LAYERS * per_layer + 2 * m * D_MODEL * OUT_PAD
    transcendentals = N_LAYERS * (B * N_HEAD * (L * L + L * LS) + 3 * m)
    return flops, transcendentals


def pallas_forward(params, packed, w_prj_pad, tgt_seq, tgt_pos, enc_output):
    npad, slf_mask = make_masks(tgt_seq)
    attn_bias = slf_mask * NEG_INF                      # additive mask, f32
    # glue: embedding-table gathers stay in plain JAX
    x = (params["emb"][tgt_seq] + params["pos"][tgt_pos]).reshape(B * L, D_MODEL)
    enc = enc_output.reshape(B * LS, D_MODEL)
    npad_flat = npad.reshape(B * L, 1)

    args = (x, enc, npad_flat, attn_bias, *packed, w_prj_pad)
    flops, transcendentals = _flop_estimate()
    bytes_accessed = sum(int(np.prod(a.shape)) * a.dtype.itemsize for a in args)
    bytes_accessed += B * L * OUT_PAD * 4

    out = pl.pallas_call(
        fused_decoder_kernel,
        out_shape=jax.ShapeDtypeStruct((B * L, OUT_PAD), jnp.float32),
        in_specs=[_vmem_spec() for _ in args],
        out_specs=_vmem_spec(),
        cost_estimate=pl.CostEstimate(flops=flops,
                                      transcendentals=transcendentals,
                                      bytes_accessed=bytes_accessed),
    )(*args)
    # == seq_logit[:, 0]: row 0 of each batch, lane un-padding
    return out.reshape(B, L, OUT_PAD)[:, 0, :OUT_SIZE]


# ---------------------------------------------------------------------------
# Parameters (deterministic synthetic init), packing, masks
# ---------------------------------------------------------------------------
def get_sinusoid_encoding_table(n_position, d_hid, padding_idx=None):
    position = np.arange(n_position)[:, None].astype(np.float64)
    hid = np.arange(d_hid)[None, :]
    angle = position / np.power(10000.0, 2.0 * (hid // 2) / d_hid)
    table = np.zeros((n_position, d_hid), dtype=np.float32)
    table[:, 0::2] = np.sin(angle[:, 0::2])
    table[:, 1::2] = np.cos(angle[:, 1::2])
    if padding_idx is not None:
        table[padding_idx] = 0.0
    return table


def _nrm(key, shape, scale=0.1):
    return scale * jax.random.normal(key, shape, dtype=jnp.float32)


def _attn_block(key):
    kk = jax.random.split(key, 8)
    wq = _nrm(kk[0], (N_HEAD, D_MODEL, D_K))
    bq = _nrm(kk[1], (N_HEAD, 1, D_K), 0.02)
    wk = _nrm(kk[2], (N_HEAD, D_MODEL, D_K))
    bk = _nrm(kk[3], (N_HEAD, 1, D_K), 0.02)
    wv = _nrm(kk[4], (N_HEAD, D_MODEL, D_V))
    bv = _nrm(kk[5], (N_HEAD, 1, D_V), 0.02)
    wo = _nrm(kk[6], (N_HEAD, D_V, D_MODEL))
    bo = _nrm(kk[7], (1, D_MODEL), 0.02)
    g = jnp.ones((1, D_MODEL), jnp.float32)
    be = jnp.zeros((1, D_MODEL), jnp.float32)
    return [wq, bq, wk, bk, wv, bv, wo, bo, g, be]


def _init_layer(key):
    ka, kb, k1, k2, k3, k4 = jax.random.split(key, 6)
    w1 = _nrm(k1, (D_MODEL, D_INNER))
    bf1 = _nrm(k2, (1, D_INNER), 0.02)
    w2 = _nrm(k3, (D_INNER, D_MODEL))
    bf2 = _nrm(k4, (1, D_MODEL), 0.02)
    g3 = jnp.ones((1, D_MODEL), jnp.float32)
    be3 = jnp.zeros((1, D_MODEL), jnp.float32)
    return _attn_block(ka) + _attn_block(kb) + [w1, bf1, w2, bf2, g3, be3]


def init_params(key):
    ks = jax.random.split(key, 2 + N_LAYERS)
    emb = _nrm(ks[0], (VOCAB, D_MODEL))
    emb = emb.at[PAD].set(0.0)                         # padding_idx=<pad>
    pos = jnp.asarray(get_sinusoid_encoding_table(L + 1, D_MODEL, padding_idx=0))
    w_prj = _nrm(ks[1], (D_MODEL, OUT_SIZE))           # (emb, out), bias=False
    layers = [_init_layer(ks[2 + i]) for i in range(N_LAYERS)]
    return {"emb": emb, "pos": pos, "w_prj": w_prj, "layers": layers}


def _pack_layer(lw):
    (wq, bq, wk, bk, wv, bv, wo, bo, g1, be1,
     wq2, bq2, wk2, bk2, wv2, bv2, wo2, bo2, g2, be2,
     w1, bf1, w2, bf2, g3, be3) = lw

    # fold the softmax 1/sqrt(d_k) scale into the Q projections (host-side)
    wq, bq = wq * SCALE, bq * SCALE
    wq2, bq2 = wq2 * SCALE, bq2 * SCALE

    def heads_cols(w):      # (H, D, d) -> (D, H*d)
        return jnp.concatenate([w[h] for h in range(N_HEAD)], axis=1)

    def heads_bias(b):      # (H, 1, d) -> (H*d,)
        return jnp.concatenate([b[h, 0] for h in range(N_HEAD)], axis=0)

    wqkv_s = jnp.concatenate([heads_cols(wq), heads_cols(wk), heads_cols(wv)],
                             axis=1)                               # (D, 96)
    wo_s = jnp.concatenate([wo[h] for h in range(N_HEAD)], axis=0)  # (H*dv, D)
    wq_e = heads_cols(wq2)                                          # (D, 32)
    wkv_e = jnp.concatenate([heads_cols(wk2), heads_cols(wv2)], axis=1)  # (D,64)
    wo_e = jnp.concatenate([wo2[h] for h in range(N_HEAD)], axis=0)

    def row(v):
        v = v.reshape(-1)
        return jnp.pad(v, (0, VEC_W - v.shape[0]))

    vecs = jnp.stack([
        row(jnp.concatenate([heads_bias(bq), heads_bias(bk), heads_bias(bv)])),
        row(bo), row(g1), row(be1),
        row(heads_bias(bq2)),
        row(jnp.concatenate([heads_bias(bk2), heads_bias(bv2)])),
        row(bo2), row(g2), row(be2),
        row(bf1), row(bf2), row(g3), row(be3),
    ], axis=0)                                                      # (13, 128)
    return (wqkv_s, wo_s, wq_e, wkv_e, wo_e, w1, w2, vecs)


def pack_params(params):
    per_layer = [_pack_layer(lw) for lw in params["layers"]]
    packed = []
    for i in range(8):
        a = jnp.stack([p[i] for p in per_layer], axis=0)
        packed.append(a if i == 7 else a.astype(BF16))   # vecs stay f32
    return packed


def make_masks(tgt_seq):
    npad = (tgt_seq != PAD).astype(jnp.float32)[:, :, None]            # (B,L,1)
    subseq = jnp.triu(jnp.ones((L, L), jnp.float32), k=1)[None, :, :]  # (1,L,L)
    keypad = (tgt_seq == PAD).astype(jnp.float32)[:, None, :]          # (B,1,L)
    slf_mask = ((keypad + subseq) > 0).astype(jnp.float32)             # (B,L,L)
    return npad, slf_mask


# ---------------------------------------------------------------------------
# Pure-JAX reference (unfused per-head math, same bf16 cast points)
# ---------------------------------------------------------------------------
def _mha_ref(q_in, kv_in, wq, bq, wk, bk, wv, bv, wo, bo, g, be, mask):
    residual = q_in
    scale = 1.0 / math.sqrt(D_K)
    acc = None
    for h in range(N_HEAD):
        qh = _mm(q_in, wq[h]) + bq[h]
        kh = _mm(kv_in, wk[h]) + bk[h]
        vh = _mm(kv_in, wv[h]) + bv[h]
        s = jax.lax.dot_general(qh.astype(BF16), kh.astype(BF16),
                                dimension_numbers=(((1,), (1,)), ((), ())),
                                preferred_element_type=jnp.float32) * scale
        if mask is not None:
            s = jnp.where(mask > 0, NEG_INF, s)
        s = s - jnp.max(s, axis=-1, keepdims=True)
        p = jnp.exp(s)
        p = p / jnp.sum(p, axis=-1, keepdims=True)
        oh = _mm(p, vh)
        contrib = _mm(oh, wo[h])
        acc = contrib if acc is None else acc + contrib
    out = acc + bo
    return _ln(out + residual, g, be)


def _decoder_layer_ref(x, enc, npad_b, mask_b, lw):
    (wq, bq, wk, bk, wv, bv, wo, bo, g1, be1,
     wq2, bq2, wk2, bk2, wv2, bv2, wo2, bo2, g2, be2,
     w1, bf1, w2, bf2, g3, be3) = lw
    out = _mha_ref(x, x, wq, bq, wk, bk, wv, bv, wo, bo, g1, be1, mask_b) * npad_b
    out = _mha_ref(out, enc, wq2, bq2, wk2, bk2, wv2, bv2, wo2, bo2,
                   g2, be2, None) * npad_b
    h = jnp.maximum(_mm(out, w1) + bf1, 0.0)
    f = _mm(h, w2) + bf2
    return _ln(f + out, g3, be3) * npad_b


def reference_forward(params, tgt_seq, tgt_pos, enc_output):
    npad, slf_mask = make_masks(tgt_seq)
    x = params["emb"][tgt_seq] + params["pos"][tgt_pos]
    for lw in params["layers"]:
        x = jnp.stack([
            _decoder_layer_ref(x[b], enc_output[b], npad[b], slf_mask[b], lw)
            for b in range(B)
        ])
    return _mm(x[:, 0, :], params["w_prj"])            # == seq_logit[:, 0]


# ---------------------------------------------------------------------------
if __name__ == "__main__":
    key = jax.random.PRNGKey(0)
    pkey, ekey = jax.random.split(key)
    params = init_params(pkey)
    packed = pack_params(params)
    # lane-dense projection slab: pad OUT_SIZE -> 128 with zero columns
    w_prj_pad = jnp.pad(params["w_prj"],
                        ((0, 0), (0, OUT_PAD - OUT_SIZE))).astype(BF16)

    tgt_seq = jnp.array([[2, 3, 4, 5, 6, 0, 0, 0],
                         [2, 7, 8, 9, 10, 11, 12, 3]], dtype=jnp.int32)
    tgt_pos = jnp.array([[1, 2, 3, 4, 5, 0, 0, 0],
                         [1, 2, 3, 4, 5, 6, 7, 8]], dtype=jnp.int32)
    enc_output = 0.5 * jax.random.normal(ekey, (B, LS, D_MODEL),
                                         dtype=jnp.float32)

    out = pallas_forward(params, packed, w_prj_pad, tgt_seq, tgt_pos, enc_output)
    out = jax.block_until_ready(out)
    assert out.shape == (B, OUT_SIZE)

    ref = reference_forward(params, tgt_seq, tgt_pos, enc_output)
    np.testing.assert_allclose(np.asarray(out), np.asarray(ref),
                               atol=2e-2, rtol=2e-2)
    print("KERNEL_OK")
</pallas_src>

<mosaic_0001>
module attributes {stable_mosaic.version = 11 : i64} {
  func.func @fused_decoder_kernel(%arg0: memref<16x32xf32, #tpu.memory_space<vmem>>, %arg1: memref<16x32xf32, #tpu.memory_space<vmem>>, %arg2: memref<16x1xf32, #tpu.memory_space<vmem>>, %arg3: memref<2x8x8xf32, #tpu.memory_space<vmem>>, %arg4: memref<2x32x96xbf16, #tpu.memory_space<vmem>>, %arg5: memref<2x32x32xbf16, #tpu.memory_space<vmem>>, %arg6: memref<2x32x32xbf16, #tpu.memory_space<vmem>>, %arg7: memref<2x32x64xbf16, #tpu.memory_space<vmem>>, %arg8: memref<2x32x32xbf16, #tpu.memory_space<vmem>>, %arg9: memref<2x32x64xbf16, #tpu.memory_space<vmem>>, %arg10: memref<2x64x32xbf16, #tpu.memory_space<vmem>>, %arg11: memref<2x13x128xf32, #tpu.memory_space<vmem>>, %arg12: memref<32x128xbf16, #tpu.memory_space<vmem>>, %arg13: memref<16x128xf32, #tpu.memory_space<vmem>>) attributes {dimension_semantics = [], scalar_prefetch = 0 : i64, scratch_operands = 0 : i64, tpu.core_type = #tpu.core_type<tc>} {
    %c0 = arith.constant 0 : index
    %c0_0 = arith.constant 0 : index
    %0 = vector.load %arg0[%c0, %c0_0] : memref<16x32xf32, #tpu.memory_space<vmem>>, vector<16x32xf32>
    %c0_1 = arith.constant 0 : index
    %c0_2 = arith.constant 0 : index
    %1 = vector.load %arg1[%c0_1, %c0_2] : memref<16x32xf32, #tpu.memory_space<vmem>>, vector<16x32xf32>
    %c0_3 = arith.constant 0 : index
    %c0_4 = arith.constant 0 : index
    %2 = vector.load %arg2[%c0_3, %c0_4] : memref<16x1xf32, #tpu.memory_space<vmem>>, vector<16x1xf32>
    %c0_5 = arith.constant 0 : index
    %c0_6 = arith.constant 0 : index
    %c0_7 = arith.constant 0 : index
    %3 = vector.load %arg3[%c0_5, %c0_6, %c0_7] : memref<2x8x8xf32, #tpu.memory_space<vmem>>, vector<2x8x8xf32>
    %c0_8 = arith.constant 0 : index
    %c0_9 = arith.constant 0 : index
    %c0_10 = arith.constant 0 : index
    %4 = vector.load %arg11[%c0_8, %c0_9, %c0_10] : memref<2x13x128xf32, #tpu.memory_space<vmem>>, vector<1x13x128xf32>
    %5 = vector.shape_cast %4 : vector<1x13x128xf32> to vector<13x128xf32>
    %c0_11 = arith.constant 0 : index
    %c0_12 = arith.constant 0 : index
    %c0_13 = arith.constant 0 : index
    %6 = vector.load %arg4[%c0_11, %c0_12, %c0_13] : memref<2x32x96xbf16, #tpu.memory_space<vmem>>, vector<1x32x96xbf16>
    %7 = vector.shape_cast %6 : vector<1x32x96xbf16> to vector<32x96xbf16>
    %8 = arith.truncf %0 : vector<16x32xf32> to vector<16x32xbf16>
    %cst = arith.constant dense<0.000000e+00> : vector<16x96xf32>
    %9 = tpu.matmul %8, %7, %cst {dimension_numbers = #tpu.dot_dimension_numbers<[1], [0], [0], [1], [0, 0, 1, 1], [], []>} : vector<16x32xbf16>, vector<32x96xbf16>, vector<16x96xf32> -> vector<16x96xf32>
    %10 = vector.extract_strided_slice %5 {offsets = [0, 0], sizes = [1, 96], strides = [1, 1]} : vector<13x128xf32> to vector<1x96xf32>
    %11 = vector.broadcast %10 : vector<1x96xf32> to vector<16x96xf32>
    %12 = arith.addf %9, %11 : vector<16x96xf32>
    %13 = vector.extract_strided_slice %12 {offsets = [0, 0], sizes = [16, 32], strides = [1, 1]} : vector<16x96xf32> to vector<16x32xf32>
    %14 = vector.shape_cast %13 : vector<16x32xf32> to vector<2x8x32xf32>
    %15 = vector.extract_strided_slice %12 {offsets = [0, 32], sizes = [16, 32], strides = [1, 1]} : vector<16x96xf32> to vector<16x32xf32>
    %16 = vector.shape_cast %15 : vector<16x32xf32> to vector<2x8x32xf32>
    %17 = vector.extract_strided_slice %12 {offsets = [0, 64], sizes = [16, 32], strides = [1, 1]} : vector<16x96xf32> to vector<16x32xf32>
    %18 = vector.shape_cast %17 : vector<16x32xf32> to vector<2x8x32xf32>
    %19 = vector.extract_strided_slice %14 {offsets = [0, 0, 0], sizes = [2, 8, 16], strides = [1, 1, 1]} : vector<2x8x32xf32> to vector<2x8x16xf32>
    %20 = arith.truncf %19 : vector<2x8x16xf32> to vector<2x8x16xbf16>
    %21 = vector.extract_strided_slice %16 {offsets = [0, 0, 0], sizes = [2, 8, 16], strides = [1, 1, 1]} : vector<2x8x32xf32> to vector<2x8x16xf32>
    %22 = arith.truncf %21 : vector<2x8x16xf32> to vector<2x8x16xbf16>
    %23 = vector.extract_strided_slice %18 {offsets = [0, 0, 0], sizes = [2, 8, 16], strides = [1, 1, 1]} : vector<2x8x32xf32> to vector<2x8x16xf32>
    %24 = arith.truncf %23 : vector<2x8x16xf32> to vector<2x8x16xbf16>
    "tpu.trace_start"() <{level = 10 : i32, message = "bqd,bkd->bqk"}> : () -> ()
    %cst_14 = arith.constant dense<0.000000e+00> : vector<2x8x8xf32>
    %25 = tpu.matmul %20, %22, %cst_14 {dimension_numbers = #tpu.dot_dimension_numbers<[2], [2], [1], [1], [0, 0, 0, 1, 1, 1], [0], [0]>} : vector<2x8x16xbf16>, vector<2x8x16xbf16>, vector<2x8x8xf32> -> vector<2x8x8xf32>
    "tpu.trace_stop"() : () -> ()
    %26 = arith.addf %25, %3 : vector<2x8x8xf32>
    %cst_15 = arith.constant dense<0xFF800000> : vector<2x8xf32>
    %27 = vector.multi_reduction <maximumf>, %26, %cst_15 [2] : vector<2x8x8xf32> to vector<2x8xf32>
    %28 = vector.shape_cast %27 : vector<2x8xf32> to vector<2x8x1xf32>
    %29 = vector.broadcast %28 : vector<2x8x1xf32> to vector<2x8x8xf32>
    %30 = arith.subf %26, %29 : vector<2x8x8xf32>
    %31 = math.exp %30 : vector<2x8x8xf32>
    %cst_16 = arith.constant dense<0.000000e+00> : vector<2x8xf32>
    %32 = vector.multi_reduction <add>, %31, %cst_16 [2] : vector<2x8x8xf32> to vector<2x8xf32>
    %33 = vector.shape_cast %32 : vector<2x8xf32> to vector<2x8x1xf32>
    %34 = tpu.reciprocal %33 {approx = true} : vector<2x8x1xf32> -> vector<2x8x1xf32>
    %35 = vector.broadcast %34 : vector<2x8x1xf32> to vector<2x8x8xf32>
    %36 = arith.mulf %31, %35 : vector<2x8x8xf32>
    %37 = arith.truncf %36 : vector<2x8x8xf32> to vector<2x8x8xbf16>
    "tpu.trace_start"() <{level = 10 : i32, message = "bqk,bkd->bqd"}> : () -> ()
    %cst_17 = arith.constant dense<0.000000e+00> : vector<2x8x16xf32>
    %38 = tpu.matmul %37, %24, %cst_17 {dimension_numbers = #tpu.dot_dimension_numbers<[2], [1], [1], [2], [0, 0, 0, 1, 1, 2], [0], [0]>} : vector<2x8x8xbf16>, vector<2x8x16xbf16>, vector<2x8x16xf32> -> vector<2x8x16xf32>
    "tpu.trace_stop"() : () -> ()
    %39 = vector.extract_strided_slice %14 {offsets = [0, 0, 16], sizes = [2, 8, 16], strides = [1, 1, 1]} : vector<2x8x32xf32> to vector<2x8x16xf32>
    %40 = arith.truncf %39 : vector<2x8x16xf32> to vector<2x8x16xbf16>
    %41 = vector.extract_strided_slice %16 {offsets = [0, 0, 16], sizes = [2, 8, 16], strides = [1, 1, 1]} : vector<2x8x32xf32> to vector<2x8x16xf32>
    %42 = arith.truncf %41 : vector<2x8x16xf32> to vector<2x8x16xbf16>
    %43 = vector.extract_strided_slice %18 {offsets = [0, 0, 16], sizes = [2, 8, 16], strides = [1, 1, 1]} : vector<2x8x32xf32> to vector<2x8x16xf32>
    %44 = arith.truncf %43 : vector<2x8x16xf32> to vector<2x8x16xbf16>
    "tpu.trace_start"() <{level = 10 : i32, message = "bqd,bkd->bqk"}> : () -> ()
    %cst_18 = arith.constant dense<0.000000e+00> : vector<2x8x8xf32>
    %45 = tpu.matmul %40, %42, %cst_18 {dimension_numbers = #tpu.dot_dimension_numbers<[2], [2], [1], [1], [0, 0, 0, 1, 1, 1], [0], [0]>} : vector<2x8x16xbf16>, vector<2x8x16xbf16>, vector<2x8x8xf32> -> vector<2x8x8xf32>
    "tpu.trace_stop"() : () -> ()
    %46 = arith.addf %45, %3 : vector<2x8x8xf32>
    %cst_19 = arith.constant dense<0xFF800000> : vector<2x8xf32>
    %47 = vector.multi_reduction <maximumf>, %46, %cst_19 [2] : vector<2x8x8xf32> to vector<2x8xf32>
    %48 = vector.shape_cast %47 : vector<2x8xf32> to vector<2x8x1xf32>
    %49 = vector.broadcast %48 : vector<2x8x1xf32> to vector<2x8x8xf32>
    %50 = arith.subf %46, %49 : vector<2x8x8xf32>
    %51 = math.exp %50 : vector<2x8x8xf32>
    %cst_20 = arith.constant dense<0.000000e+00> : vector<2x8xf32>
    %52 = vector.multi_reduction <add>, %51, %cst_20 [2] : vector<2x8x8xf32> to vector<2x8xf32>
    %53 = vector.shape_cast %52 : vector<2x8xf32> to vector<2x8x1xf32>
    %54 = tpu.reciprocal %53 {approx = true} : vector<2x8x1xf32> -> vector<2x8x1xf32>
    %55 = vector.broadcast %54 : vector<2x8x1xf32> to vector<2x8x8xf32>
    %56 = arith.mulf %51, %55 : vector<2x8x8xf32>
    %57 = arith.truncf %56 : vector<2x8x8xf32> to vector<2x8x8xbf16>
    "tpu.trace_start"() <{level = 10 : i32, message = "bqk,bkd->bqd"}> : () -> ()
    %cst_21 = arith.constant dense<0.000000e+00> : vector<2x8x16xf32>
    %58 = tpu.matmul %57, %44, %cst_21 {dimension_numbers = #tpu.dot_dimension_numbers<[2], [1], [1], [2], [0, 0, 0, 1, 1, 2], [0], [0]>} : vector<2x8x8xbf16>, vector<2x8x16xbf16>, vector<2x8x16xf32> -> vector<2x8x16xf32>
    "tpu.trace_stop"() : () -> ()
    %59 = tpu.concatenate %38, %58 in 2 : vector<2x8x16xf32>, vector<2x8x16xf32> -> vector<2x8x32xf32>
    %60 = vector.shape_cast %59 : vector<2x8x32xf32> to vector<16x32xf32>
    %c0_22 = arith.constant 0 : index
    %c0_23 = arith.constant 0 : index
    %c0_24 = arith.constant 0 : index
    %61 = vector.load %arg5[%c0_22, %c0_23, %c0_24] : memref<2x32x32xbf16, #tpu.memory_space<vmem>>, vector<1x32x32xbf16>
    %62 = vector.shape_cast %61 : vector<1x32x32xbf16> to vector<32x32xbf16>
    %63 = arith.truncf %60 : vector<16x32xf32> to vector<16x32xbf16>
    %cst_25 = arith.constant dense<0.000000e+00> : vector<16x32xf32>
    %64 = tpu.matmul %63, %62, %cst_25 {dimension_numbers = #tpu.dot_dimension_numbers<[1], [0], [0], [1], [0, 0, 1, 1], [], []>} : vector<16x32xbf16>, vector<32x32xbf16>, vector<16x32xf32> -> vector<16x32xf32>
    %65 = vector.extract_strided_slice %5 {offsets = [1, 0], sizes = [1, 32], strides = [1, 1]} : vector<13x128xf32> to vector<1x32xf32>
    %66 = vector.broadcast %65 : vector<1x32xf32> to vector<16x32xf32>
    %67 = arith.addf %64, %66 : vector<16x32xf32>
    %68 = arith.addf %67, %0 : vector<16x32xf32>
    %69 = vector.extract_strided_slice %5 {offsets = [2, 0], sizes = [1, 32], strides = [1, 1]} : vector<13x128xf32> to vector<1x32xf32>
    %70 = vector.extract_strided_slice %5 {offsets = [3, 0], sizes = [1, 32], strides = [1, 1]} : vector<13x128xf32> to vector<1x32xf32>
    %cst_26 = arith.constant dense<0.000000e+00> : vector<16xf32>
    %71 = vector.multi_reduction <add>, %68, %cst_26 [1] : vector<16x32xf32> to vector<16xf32>
    %72 = vector.shape_cast %71 : vector<16xf32> to vector<16x1xf32>
    %cst_27 = arith.constant 3.200000e+01 : f32
    %73 = vector.broadcast %cst_27 : f32 to vector<16x1xf32>
    %74 = arith.divf %72, %73 : vector<16x1xf32>
    %75 = vector.broadcast %74 : vector<16x1xf32> to vector<16x32xf32>
    %76 = arith.subf %68, %75 : vector<16x32xf32>
    %77 = arith.mulf %76, %76 : vector<16x32xf32>
    %cst_28 = arith.constant dense<0.000000e+00> : vector<16xf32>
    %78 = vector.multi_reduction <add>, %77, %cst_28 [1] : vector<16x32xf32> to vector<16xf32>
    %79 = vector.shape_cast %78 : vector<16xf32> to vector<16x1xf32>
    %cst_29 = arith.constant 3.200000e+01 : f32
    %80 = vector.broadcast %cst_29 : f32 to vector<16x1xf32>
    %81 = arith.divf %79, %80 : vector<16x1xf32>
    %82 = vector.broadcast %74 : vector<16x1xf32> to vector<16x32xf32>
    %83 = arith.subf %68, %82 : vector<16x32xf32>
    %cst_30 = arith.constant 9.99999974E-6 : f32
    %84 = vector.broadcast %cst_30 : f32 to vector<16x1xf32>
    %85 = arith.addf %81, %84 : vector<16x1xf32>
    %86 = math.rsqrt %85 : vector<16x1xf32>
    %87 = vector.broadcast %86 : vector<16x1xf32> to vector<16x32xf32>
    %88 = arith.mulf %83, %87 : vector<16x32xf32>
    %89 = vector.broadcast %69 : vector<1x32xf32> to vector<16x32xf32>
    %90 = arith.mulf %88, %89 : vector<16x32xf32>
    %91 = vector.broadcast %70 : vector<1x32xf32> to vector<16x32xf32>
    %92 = arith.addf %90, %91 : vector<16x32xf32>
    %93 = vector.broadcast %2 : vector<16x1xf32> to vector<16x32xf32>
    %94 = arith.mulf %92, %93 : vector<16x32xf32>
    %c0_31 = arith.constant 0 : index
    %c0_32 = arith.constant 0 : index
    %c0_33 = arith.constant 0 : index
    %95 = vector.load %arg6[%c0_31, %c0_32, %c0_33] : memref<2x32x32xbf16, #tpu.memory_space<vmem>>, vector<1x32x32xbf16>
    %96 = vector.shape_cast %95 : vector<1x32x32xbf16> to vector<32x32xbf16>
    %97 = arith.truncf %94 : vector<16x32xf32> to vector<16x32xbf16>
    %cst_34 = arith.constant dense<0.000000e+00> : vector<16x32xf32>
    %98 = tpu.matmul %97, %96, %cst_34 {dimension_numbers = #tpu.dot_dimension_numbers<[1], [0], [0], [1], [0, 0, 1, 1], [], []>} : vector<16x32xbf16>, vector<32x32xbf16>, vector<16x32xf32> -> vector<16x32xf32>
    %99 = vector.extract_strided_slice %5 {offsets = [4, 0], sizes = [1, 32], strides = [1, 1]} : vector<13x128xf32> to vector<1x32xf32>
    %100 = vector.broadcast %99 : vector<1x32xf32> to vector<16x32xf32>
    %101 = arith.addf %98, %100 : vector<16x32xf32>
    %102 = vector.shape_cast %101 : vector<16x32xf32> to vector<2x8x32xf32>
    %c0_35 = arith.constant 0 : index
    %c0_36 = arith.constant 0 : index
    %c0_37 = arith.constant 0 : index
    %103 = vector.load %arg7[%c0_35, %c0_36, %c0_37] : memref<2x32x64xbf16, #tpu.memory_space<vmem>>, vector<1x32x64xbf16>
    %104 = vector.shape_cast %103 : vector<1x32x64xbf16> to vector<32x64xbf16>
    %105 = arith.truncf %1 : vector<16x32xf32> to vector<16x32xbf16>
    %cst_38 = arith.constant dense<0.000000e+00> : vector<16x64xf32>
    %106 = tpu.matmul %105, %104, %cst_38 {dimension_numbers = #tpu.dot_dimension_numbers<[1], [0], [0], [1], [0, 0, 1, 1], [], []>} : vector<16x32xbf16>, vector<32x64xbf16>, vector<16x64xf32> -> vector<16x64xf32>
    %107 = vector.extract_strided_slice %5 {offsets = [5, 0], sizes = [1, 64], strides = [1, 1]} : vector<13x128xf32> to vector<1x64xf32>
    %108 = vector.broadcast %107 : vector<1x64xf32> to vector<16x64xf32>
    %109 = arith.addf %106, %108 : vector<16x64xf32>
    %110 = vector.extract_strided_slice %109 {offsets = [0, 0], sizes = [16, 32], strides = [1, 1]} : vector<16x64xf32> to vector<16x32xf32>
    %111 = vector.shape_cast %110 : vector<16x32xf32> to vector<2x8x32xf32>
    %112 = vector.extract_strided_slice %109 {offsets = [0, 32], sizes = [16, 32], strides = [1, 1]} : vector<16x64xf32> to vector<16x32xf32>
    %113 = vector.shape_cast %112 : vector<16x32xf32> to vector<2x8x32xf32>
    %114 = vector.extract_strided_slice %102 {offsets = [0, 0, 0], sizes = [2, 8, 16], strides = [1, 1, 1]} : vector<2x8x32xf32> to vector<2x8x16xf32>
    %115 = arith.truncf %114 : vector<2x8x16xf32> to vector<2x8x16xbf16>
    %116 = vector.extract_strided_slice %111 {offsets = [0, 0, 0], sizes = [2, 8, 16], strides = [1, 1, 1]} : vector<2x8x32xf32> to vector<2x8x16xf32>
    %117 = arith.truncf %116 : vector<2x8x16xf32> to vector<2x8x16xbf16>
    %118 = vector.extract_strided_slice %113 {offsets = [0, 0, 0], sizes = [2, 8, 16], strides = [1, 1, 1]} : vector<2x8x32xf32> to vector<2x8x16xf32>
    %119 = arith.truncf %118 : vector<2x8x16xf32> to vector<2x8x16xbf16>
    "tpu.trace_start"() <{level = 10 : i32, message = "bqd,bkd->bqk"}> : () -> ()
    %cst_39 = arith.constant dense<0.000000e+00> : vector<2x8x8xf32>
    %120 = tpu.matmul %115, %117, %cst_39 {dimension_numbers = #tpu.dot_dimension_numbers<[2], [2], [1], [1], [0, 0, 0, 1, 1, 1], [0], [0]>} : vector<2x8x16xbf16>, vector<2x8x16xbf16>, vector<2x8x8xf32> -> vector<2x8x8xf32>
    "tpu.trace_stop"() : () -> ()
    %cst_40 = arith.constant dense<0xFF800000> : vector<2x8xf32>
    %121 = vector.multi_reduction <maximumf>, %120, %cst_40 [2] : vector<2x8x8xf32> to vector<2x8xf32>
    %122 = vector.shape_cast %121 : vector<2x8xf32> to vector<2x8x1xf32>
    %123 = vector.broadcast %122 : vector<2x8x1xf32> to vector<2x8x8xf32>
    %124 = arith.subf %120, %123 : vector<2x8x8xf32>
    %125 = math.exp %124 : vector<2x8x8xf32>
    %cst_41 = arith.constant dense<0.000000e+00> : vector<2x8xf32>
    %126 = vector.multi_reduction <add>, %125, %cst_41 [2] : vector<2x8x8xf32> to vector<2x8xf32>
    %127 = vector.shape_cast %126 : vector<2x8xf32> to vector<2x8x1xf32>
    %128 = tpu.reciprocal %127 {approx = true} : vector<2x8x1xf32> -> vector<2x8x1xf32>
    %129 = vector.broadcast %128 : vector<2x8x1xf32> to vector<2x8x8xf32>
    %130 = arith.mulf %125, %129 : vector<2x8x8xf32>
    %131 = arith.truncf %130 : vector<2x8x8xf32> to vector<2x8x8xbf16>
    "tpu.trace_start"() <{level = 10 : i32, message = "bqk,bkd->bqd"}> : () -> ()
    %cst_42 = arith.constant dense<0.000000e+00> : vector<2x8x16xf32>
    %132 = tpu.matmul %131, %119, %cst_42 {dimension_numbers = #tpu.dot_dimension_numbers<[2], [1], [1], [2], [0, 0, 0, 1, 1, 2], [0], [0]>} : vector<2x8x8xbf16>, vector<2x8x16xbf16>, vector<2x8x16xf32> -> vector<2x8x16xf32>
    "tpu.trace_stop"() : () -> ()
    %133 = vector.extract_strided_slice %102 {offsets = [0, 0, 16], sizes = [2, 8, 16], strides = [1, 1, 1]} : vector<2x8x32xf32> to vector<2x8x16xf32>
    %134 = arith.truncf %133 : vector<2x8x16xf32> to vector<2x8x16xbf16>
    %135 = vector.extract_strided_slice %111 {offsets = [0, 0, 16], sizes = [2, 8, 16], strides = [1, 1, 1]} : vector<2x8x32xf32> to vector<2x8x16xf32>
    %136 = arith.truncf %135 : vector<2x8x16xf32> to vector<2x8x16xbf16>
    %137 = vector.extract_strided_slice %113 {offsets = [0, 0, 16], sizes = [2, 8, 16], strides = [1, 1, 1]} : vector<2x8x32xf32> to vector<2x8x16xf32>
    %138 = arith.truncf %137 : vector<2x8x16xf32> to vector<2x8x16xbf16>
    "tpu.trace_start"() <{level = 10 : i32, message = "bqd,bkd->bqk"}> : () -> ()
    %cst_43 = arith.constant dense<0.000000e+00> : vector<2x8x8xf32>
    %139 = tpu.matmul %134, %136, %cst_43 {dimension_numbers = #tpu.dot_dimension_numbers<[2], [2], [1], [1], [0, 0, 0, 1, 1, 1], [0], [0]>} : vector<2x8x16xbf16>, vector<2x8x16xbf16>, vector<2x8x8xf32> -> vector<2x8x8xf32>
    "tpu.trace_stop"() : () -> ()
    %cst_44 = arith.constant dense<0xFF800000> : vector<2x8xf32>
    %140 = vector.multi_reduction <maximumf>, %139, %cst_44 [2] : vector<2x8x8xf32> to vector<2x8xf32>
    %141 = vector.shape_cast %140 : vector<2x8xf32> to vector<2x8x1xf32>
    %142 = vector.broadcast %141 : vector<2x8x1xf32> to vector<2x8x8xf32>
    %143 = arith.subf %139, %142 : vector<2x8x8xf32>
    %144 = math.exp %143 : vector<2x8x8xf32>
    %cst_45 = arith.constant dense<0.000000e+00> : vector<2x8xf32>
    %145 = vector.multi_reduction <add>, %144, %cst_45 [2] : vector<2x8x8xf32> to vector<2x8xf32>
    %146 = vector.shape_cast %145 : vector<2x8xf32> to vector<2x8x1xf32>
    %147 = tpu.reciprocal %146 {approx = true} : vector<2x8x1xf32> -> vector<2x8x1xf32>
    %148 = vector.broadcast %147 : vector<2x8x1xf32> to vector<2x8x8xf32>
    %149 = arith.mulf %144, %148 : vector<2x8x8xf32>
    %150 = arith.truncf %149 : vector<2x8x8xf32> to vector<2x8x8xbf16>
    "tpu.trace_start"() <{level = 10 : i32, message = "bqk,bkd->bqd"}> : () -> ()
    %cst_46 = arith.constant dense<0.000000e+00> : vector<2x8x16xf32>
    %151 = tpu.matmul %150, %138, %cst_46 {dimension_numbers = #tpu.dot_dimension_numbers<[2], [1], [1], [2], [0, 0, 0, 1, 1, 2], [0], [0]>} : vector<2x8x8xbf16>, vector<2x8x16xbf16>, vector<2x8x16xf32> -> vector<2x8x16xf32>
    "tpu.trace_stop"() : () -> ()
    %152 = tpu.concatenate %132, %151 in 2 : vector<2x8x16xf32>, vector<2x8x16xf32> -> vector<2x8x32xf32>
    %153 = vector.shape_cast %152 : vector<2x8x32xf32> to vector<16x32xf32>
    %c0_47 = arith.constant 0 : index
    %c0_48 = arith.constant 0 : index
    %c0_49 = arith.constant 0 : index
    %154 = vector.load %arg8[%c0_47, %c0_48, %c0_49] : memref<2x32x32xbf16, #tpu.memory_space<vmem>>, vector<1x32x32xbf16>
    %155 = vector.shape_cast %154 : vector<1x32x32xbf16> to vector<32x32xbf16>
    %156 = arith.truncf %153 : vector<16x32xf32> to vector<16x32xbf16>
    %cst_50 = arith.constant dense<0.000000e+00> : vector<16x32xf32>
    %157 = tpu.matmul %156, %155, %cst_50 {dimension_numbers = #tpu.dot_dimension_numbers<[1], [0], [0], [1], [0, 0, 1, 1], [], []>} : vector<16x32xbf16>, vector<32x32xbf16>, vector<16x32xf32> -> vector<16x32xf32>
    %158 = vector.extract_strided_slice %5 {offsets = [6, 0], sizes = [1, 32], strides = [1, 1]} : vector<13x128xf32> to vector<1x32xf32>
    %159 = vector.broadcast %158 : vector<1x32xf32> to vector<16x32xf32>
    %160 = arith.addf %157, %159 : vector<16x32xf32>
    %161 = arith.addf %160, %94 : vector<16x32xf32>
    %162 = vector.extract_strided_slice %5 {offsets = [7, 0], sizes = [1, 32], strides = [1, 1]} : vector<13x128xf32> to vector<1x32xf32>
    %163 = vector.extract_strided_slice %5 {offsets = [8, 0], sizes = [1, 32], strides = [1, 1]} : vector<13x128xf32> to vector<1x32xf32>
    %cst_51 = arith.constant dense<0.000000e+00> : vector<16xf32>
    %164 = vector.multi_reduction <add>, %161, %cst_51 [1] : vector<16x32xf32> to vector<16xf32>
    %165 = vector.shape_cast %164 : vector<16xf32> to vector<16x1xf32>
    %cst_52 = arith.constant 3.200000e+01 : f32
    %166 = vector.broadcast %cst_52 : f32 to vector<16x1xf32>
    %167 = arith.divf %165, %166 : vector<16x1xf32>
    %168 = vector.broadcast %167 : vector<16x1xf32> to vector<16x32xf32>
    %169 = arith.subf %161, %168 : vector<16x32xf32>
    %170 = arith.mulf %169, %169 : vector<16x32xf32>
    %cst_53 = arith.constant dense<0.000000e+00> : vector<16xf32>
    %171 = vector.multi_reduction <add>, %170, %cst_53 [1] : vector<16x32xf32> to vector<16xf32>
    %172 = vector.shape_cast %171 : vector<16xf32> to vector<16x1xf32>
    %cst_54 = arith.constant 3.200000e+01 : f32
    %173 = vector.broadcast %cst_54 : f32 to vector<16x1xf32>
    %174 = arith.divf %172, %173 : vector<16x1xf32>
    %175 = vector.broadcast %167 : vector<16x1xf32> to vector<16x32xf32>
    %176 = arith.subf %161, %175 : vector<16x32xf32>
    %cst_55 = arith.constant 9.99999974E-6 : f32
    %177 = vector.broadcast %cst_55 : f32 to vector<16x1xf32>
    %178 = arith.addf %174, %177 : vector<16x1xf32>
    %179 = math.rsqrt %178 : vector<16x1xf32>
    %180 = vector.broadcast %179 : vector<16x1xf32> to vector<16x32xf32>
    %181 = arith.mulf %176, %180 : vector<16x32xf32>
    %182 = vector.broadcast %162 : vector<1x32xf32> to vector<16x32xf32>
    %183 = arith.mulf %181, %182 : vector<16x32xf32>
    %184 = vector.broadcast %163 : vector<1x32xf32> to vector<16x32xf32>
    %185 = arith.addf %183, %184 : vector<16x32xf32>
    %186 = vector.broadcast %2 : vector<16x1xf32> to vector<16x32xf32>
    %187 = arith.mulf %185, %186 : vector<16x32xf32>
    %c0_56 = arith.constant 0 : index
    %c0_57 = arith.constant 0 : index
    %c0_58 = arith.constant 0 : index
    %188 = vector.load %arg9[%c0_56, %c0_57, %c0_58] : memref<2x32x64xbf16, #tpu.memory_space<vmem>>, vector<1x32x64xbf16>
    %189 = vector.shape_cast %188 : vector<1x32x64xbf16> to vector<32x64xbf16>
    %190 = arith.truncf %187 : vector<16x32xf32> to vector<16x32xbf16>
    %cst_59 = arith.constant dense<0.000000e+00> : vector<16x64xf32>
    %191 = tpu.matmul %190, %189, %cst_59 {dimension_numbers = #tpu.dot_dimension_numbers<[1], [0], [0], [1], [0, 0, 1, 1], [], []>} : vector<16x32xbf16>, vector<32x64xbf16>, vector<16x64xf32> -> vector<16x64xf32>
    %192 = vector.extract_strided_slice %5 {offsets = [9, 0], sizes = [1, 64], strides = [1, 1]} : vector<13x128xf32> to vector<1x64xf32>
    %193 = vector.broadcast %192 : vector<1x64xf32> to vector<16x64xf32>
    %194 = arith.addf %191, %193 : vector<16x64xf32>
    %cst_60 = arith.constant 0.000000e+00 : f32
    %195 = vector.broadcast %cst_60 : f32 to vector<16x64xf32>
    %196 = arith.maximumf %194, %195 : vector<16x64xf32>
    %c0_61 = arith.constant 0 : index
    %c0_62 = arith.constant 0 : index
    %c0_63 = arith.constant 0 : index
    %197 = vector.load %arg10[%c0_61, %c0_62, %c0_63] : memref<2x64x32xbf16, #tpu.memory_space<vmem>>, vector<1x64x32xbf16>
    %198 = vector.shape_cast %197 : vector<1x64x32xbf16> to vector<64x32xbf16>
    %199 = arith.truncf %196 : vector<16x64xf32> to vector<16x64xbf16>
    %cst_64 = arith.constant dense<0.000000e+00> : vector<16x32xf32>
    %200 = tpu.matmul %199, %198, %cst_64 {dimension_numbers = #tpu.dot_dimension_numbers<[1], [0], [0], [1], [0, 0, 1, 1], [], []>} : vector<16x64xbf16>, vector<64x32xbf16>, vector<16x32xf32> -> vector<16x32xf32>
    %201 = vector.extract_strided_slice %5 {offsets = [10, 0], sizes = [1, 32], strides = [1, 1]} : vector<13x128xf32> to vector<1x32xf32>
    %202 = vector.broadcast %201 : vector<1x32xf32> to vector<16x32xf32>
    %203 = arith.addf %200, %202 : vector<16x32xf32>
    %204 = arith.addf %203, %187 : vector<16x32xf32>
    %205 = vector.extract_strided_slice %5 {offsets = [11, 0], sizes = [1, 32], strides = [1, 1]} : vector<13x128xf32> to vector<1x32xf32>
    %206 = vector.extract_strided_slice %5 {offsets = [12, 0], sizes = [1, 32], strides = [1, 1]} : vector<13x128xf32> to vector<1x32xf32>
    %cst_65 = arith.constant dense<0.000000e+00> : vector<16xf32>
    %207 = vector.multi_reduction <add>, %204, %cst_65 [1] : vector<16x32xf32> to vector<16xf32>
    %208 = vector.shape_cast %207 : vector<16xf32> to vector<16x1xf32>
    %cst_66 = arith.constant 3.200000e+01 : f32
    %209 = vector.broadcast %cst_66 : f32 to vector<16x1xf32>
    %210 = arith.divf %208, %209 : vector<16x1xf32>
    %211 = vector.broadcast %210 : vector<16x1xf32> to vector<16x32xf32>
    %212 = arith.subf %204, %211 : vector<16x32xf32>
    %213 = arith.mulf %212, %212 : vector<16x32xf32>
    %cst_67 = arith.constant dense<0.000000e+00> : vector<16xf32>
    %214 = vector.multi_reduction <add>, %213, %cst_67 [1] : vector<16x32xf32> to vector<16xf32>
    %215 = vector.shape_cast %214 : vector<16xf32> to vector<16x1xf32>
    %cst_68 = arith.constant 3.200000e+01 : f32
    %216 = vector.broadcast %cst_68 : f32 to vector<16x1xf32>
    %217 = arith.divf %215, %216 : vector<16x1xf32>
    %218 = vector.broadcast %210 : vector<16x1xf32> to vector<16x32xf32>
    %219 = arith.subf %204, %218 : vector<16x32xf32>
    %cst_69 = arith.constant 9.99999974E-6 : f32
    %220 = vector.broadcast %cst_69 : f32 to vector<16x1xf32>
    %221 = arith.addf %217, %220 : vector<16x1xf32>
    %222 = math.rsqrt %221 : vector<16x1xf32>
    %223 = vector.broadcast %222 : vector<16x1xf32> to vector<16x32xf32>
    %224 = arith.mulf %219, %223 : vector<16x32xf32>
    %225 = vector.broadcast %205 : vector<1x32xf32> to vector<16x32xf32>
    %226 = arith.mulf %224, %225 : vector<16x32xf32>
    %227 = vector.broadcast %206 : vector<1x32xf32> to vector<16x32xf32>
    %228 = arith.addf %226, %227 : vector<16x32xf32>
    %229 = vector.broadcast %2 : vector<16x1xf32> to vector<16x32xf32>
    %230 = arith.mulf %228, %229 : vector<16x32xf32>
    %c1 = arith.constant 1 : index
    %c0_70 = arith.constant 0 : index
    %c0_71 = arith.constant 0 : index
    %231 = vector.load %arg11[%c1, %c0_70, %c0_71] : memref<2x13x128xf32, #tpu.memory_space<vmem>>, vector<1x13x128xf32>
    %232 = vector.shape_cast %231 : vector<1x13x128xf32> to vector<13x128xf32>
    %c1_72 = arith.constant 1 : index
    %c0_73 = arith.constant 0 : index
    %c0_74 = arith.constant 0 : index
    %233 = vector.load %arg4[%c1_72, %c0_73, %c0_74] : memref<2x32x96xbf16, #tpu.memory_space<vmem>>, vector<1x32x96xbf16>
    %234 = vector.shape_cast %233 : vector<1x32x96xbf16> to vector<32x96xbf16>
    %235 = arith.truncf %230 : vector<16x32xf32> to vector<16x32xbf16>
    %cst_75 = arith.constant dense<0.000000e+00> : vector<16x96xf32>
    %236 = tpu.matmul %235, %234, %cst_75 {dimension_numbers = #tpu.dot_dimension_numbers<[1], [0], [0], [1], [0, 0, 1, 1], [], []>} : vector<16x32xbf16>, vector<32x96xbf16>, vector<16x96xf32> -> vector<16x96xf32>
    %237 = vector.extract_strided_slice %232 {offsets = [0, 0], sizes = [1, 96], strides = [1, 1]} : vector<13x128xf32> to vector<1x96xf32>
    %238 = vector.broadcast %237 : vector<1x96xf32> to vector<16x96xf32>
    %239 = arith.addf %236, %238 : vector<16x96xf32>
    %240 = vector.extract_strided_slice %239 {offsets = [0, 0], sizes = [16, 32], strides = [1, 1]} : vector<16x96xf32> to vector<16x32xf32>
    %241 = vector.shape_cast %240 : vector<16x32xf32> to vector<2x8x32xf32>
    %242 = vector.extract_strided_slice %239 {offsets = [0, 32], sizes = [16, 32], strides = [1, 1]} : vector<16x96xf32> to vector<16x32xf32>
    %243 = vector.shape_cast %242 : vector<16x32xf32> to vector<2x8x32xf32>
    %244 = vector.extract_strided_slice %239 {offsets = [0, 64], sizes = [16, 32], strides = [1, 1]} : vector<16x96xf32> to vector<16x32xf32>
    %245 = vector.shape_cast %244 : vector<16x32xf32> to vector<2x8x32xf32>
    %246 = vector.extract_strided_slice %241 {offsets = [0, 0, 0], sizes = [2, 8, 16], strides = [1, 1, 1]} : vector<2x8x32xf32> to vector<2x8x16xf32>
    %247 = arith.truncf %246 : vector<2x8x16xf32> to vector<2x8x16xbf16>
    %248 = vector.extract_strided_slice %243 {offsets = [0, 0, 0], sizes = [2, 8, 16], strides = [1, 1, 1]} : vector<2x8x32xf32> to vector<2x8x16xf32>
    %249 = arith.truncf %248 : vector<2x8x16xf32> to vector<2x8x16xbf16>
    %250 = vector.extract_strided_slice %245 {offsets = [0, 0, 0], sizes = [2, 8, 16], strides = [1, 1, 1]} : vector<2x8x32xf32> to vector<2x8x16xf32>
    %251 = arith.truncf %250 : vector<2x8x16xf32> to vector<2x8x16xbf16>
    "tpu.trace_start"() <{level = 10 : i32, message = "bqd,bkd->bqk"}> : () -> ()
    %cst_76 = arith.constant dense<0.000000e+00> : vector<2x8x8xf32>
    %252 = tpu.matmul %247, %249, %cst_76 {dimension_numbers = #tpu.dot_dimension_numbers<[2], [2], [1], [1], [0, 0, 0, 1, 1, 1], [0], [0]>} : vector<2x8x16xbf16>, vector<2x8x16xbf16>, vector<2x8x8xf32> -> vector<2x8x8xf32>
    "tpu.trace_stop"() : () -> ()
    %253 = arith.addf %252, %3 : vector<2x8x8xf32>
    %cst_77 = arith.constant dense<0xFF800000> : vector<2x8xf32>
    %254 = vector.multi_reduction <maximumf>, %253, %cst_77 [2] : vector<2x8x8xf32> to vector<2x8xf32>
    %255 = vector.shape_cast %254 : vector<2x8xf32> to vector<2x8x1xf32>
    %256 = vector.broadcast %255 : vector<2x8x1xf32> to vector<2x8x8xf32>
    %257 = arith.subf %253, %256 : vector<2x8x8xf32>
    %258 = math.exp %257 : vector<2x8x8xf32>
    %cst_78 = arith.constant dense<0.000000e+00> : vector<2x8xf32>
    %259 = vector.multi_reduction <add>, %258, %cst_78 [2] : vector<2x8x8xf32> to vector<2x8xf32>
    %260 = vector.shape_cast %259 : vector<2x8xf32> to vector<2x8x1xf32>
    %261 = tpu.reciprocal %260 {approx = true} : vector<2x8x1xf32> -> vector<2x8x1xf32>
    %262 = vector.broadcast %261 : vector<2x8x1xf32> to vector<2x8x8xf32>
    %263 = arith.mulf %258, %262 : vector<2x8x8xf32>
    %264 = arith.truncf %263 : vector<2x8x8xf32> to vector<2x8x8xbf16>
    "tpu.trace_start"() <{level = 10 : i32, message = "bqk,bkd->bqd"}> : () -> ()
    %cst_79 = arith.constant dense<0.000000e+00> : vector<2x8x16xf32>
    %265 = tpu.matmul %264, %251, %cst_79 {dimension_numbers = #tpu.dot_dimension_numbers<[2], [1], [1], [2], [0, 0, 0, 1, 1, 2], [0], [0]>} : vector<2x8x8xbf16>, vector<2x8x16xbf16>, vector<2x8x16xf32> -> vector<2x8x16xf32>
    "tpu.trace_stop"() : () -> ()
    %266 = vector.extract_strided_slice %241 {offsets = [0, 0, 16], sizes = [2, 8, 16], strides = [1, 1, 1]} : vector<2x8x32xf32> to vector<2x8x16xf32>
    %267 = arith.truncf %266 : vector<2x8x16xf32> to vector<2x8x16xbf16>
    %268 = vector.extract_strided_slice %243 {offsets = [0, 0, 16], sizes = [2, 8, 16], strides = [1, 1, 1]} : vector<2x8x32xf32> to vector<2x8x16xf32>
    %269 = arith.truncf %268 : vector<2x8x16xf32> to vector<2x8x16xbf16>
    %270 = vector.extract_strided_slice %245 {offsets = [0, 0, 16], sizes = [2, 8, 16], strides = [1, 1, 1]} : vector<2x8x32xf32> to vector<2x8x16xf32>
    %271 = arith.truncf %270 : vector<2x8x16xf32> to vector<2x8x16xbf16>
    "tpu.trace_start"() <{level = 10 : i32, message = "bqd,bkd->bqk"}> : () -> ()
    %cst_80 = arith.constant dense<0.000000e+00> : vector<2x8x8xf32>
    %272 = tpu.matmul %267, %269, %cst_80 {dimension_numbers = #tpu.dot_dimension_numbers<[2], [2], [1], [1], [0, 0, 0, 1, 1, 1], [0], [0]>} : vector<2x8x16xbf16>, vector<2x8x16xbf16>, vector<2x8x8xf32> -> vector<2x8x8xf32>
    "tpu.trace_stop"() : () -> ()
    %273 = arith.addf %272, %3 : vector<2x8x8xf32>
    %cst_81 = arith.constant dense<0xFF800000> : vector<2x8xf32>
    %274 = vector.multi_reduction <maximumf>, %273, %cst_81 [2] : vector<2x8x8xf32> to vector<2x8xf32>
    %275 = vector.shape_cast %274 : vector<2x8xf32> to vector<2x8x1xf32>
    %276 = vector.broadcast %275 : vector<2x8x1xf32> to vector<2x8x8xf32>
    %277 = arith.subf %273, %276 : vector<2x8x8xf32>
    %278 = math.exp %277 : vector<2x8x8xf32>
    %cst_82 = arith.constant dense<0.000000e+00> : vector<2x8xf32>
    %279 = vector.multi_reduction <add>, %278, %cst_82 [2] : vector<2x8x8xf32> to vector<2x8xf32>
    %280 = vector.shape_cast %279 : vector<2x8xf32> to vector<2x8x1xf32>
    %281 = tpu.reciprocal %280 {approx = true} : vector<2x8x1xf32> -> vector<2x8x1xf32>
    %282 = vector.broadcast %281 : vector<2x8x1xf32> to vector<2x8x8xf32>
    %283 = arith.mulf %278, %282 : vector<2x8x8xf32>
    %284 = arith.truncf %283 : vector<2x8x8xf32> to vector<2x8x8xbf16>
    "tpu.trace_start"() <{level = 10 : i32, message = "bqk,bkd->bqd"}> : () -> ()
    %cst_83 = arith.constant dense<0.000000e+00> : vector<2x8x16xf32>
    %285 = tpu.matmul %284, %271, %cst_83 {dimension_numbers = #tpu.dot_dimension_numbers<[2], [1], [1], [2], [0, 0, 0, 1, 1, 2], [0], [0]>} : vector<2x8x8xbf16>, vector<2x8x16xbf16>, vector<2x8x16xf32> -> vector<2x8x16xf32>
    "tpu.trace_stop"() : () -> ()
    %286 = tpu.concatenate %265, %285 in 2 : vector<2x8x16xf32>, vector<2x8x16xf32> -> vector<2x8x32xf32>
    %287 = vector.shape_cast %286 : vector<2x8x32xf32> to vector<16x32xf32>
    %c1_84 = arith.constant 1 : index
    %c0_85 = arith.constant 0 : index
    %c0_86 = arith.constant 0 : index
    %288 = vector.load %arg5[%c1_84, %c0_85, %c0_86] : memref<2x32x32xbf16, #tpu.memory_space<vmem>>, vector<1x32x32xbf16>
    %289 = vector.shape_cast %288 : vector<1x32x32xbf16> to vector<32x32xbf16>
    %290 = arith.truncf %287 : vector<16x32xf32> to vector<16x32xbf16>
    %cst_87 = arith.constant dense<0.000000e+00> : vector<16x32xf32>
    %291 = tpu.matmul %290, %289, %cst_87 {dimension_numbers = #tpu.dot_dimension_numbers<[1], [0], [0], [1], [0, 0, 1, 1], [], []>} : vector<16x32xbf16>, vector<32x32xbf16>, vector<16x32xf32> -> vector<16x32xf32>
    %292 = vector.extract_strided_slice %232 {offsets = [1, 0], sizes = [1, 32], strides = [1, 1]} : vector<13x128xf32> to vector<1x32xf32>
    %293 = vector.broadcast %292 : vector<1x32xf32> to vector<16x32xf32>
    %294 = arith.addf %291, %293 : vector<16x32xf32>
    %295 = arith.addf %294, %230 : vector<16x32xf32>
    %296 = vector.extract_strided_slice %232 {offsets = [2, 0], sizes = [1, 32], strides = [1, 1]} : vector<13x128xf32> to vector<1x32xf32>
    %297 = vector.extract_strided_slice %232 {offsets = [3, 0], sizes = [1, 32], strides = [1, 1]} : vector<13x128xf32> to vector<1x32xf32>
    %cst_88 = arith.constant dense<0.000000e+00> : vector<16xf32>
    %298 = vector.multi_reduction <add>, %295, %cst_88 [1] : vector<16x32xf32> to vector<16xf32>
    %299 = vector.shape_cast %298 : vector<16xf32> to vector<16x1xf32>
    %cst_89 = arith.constant 3.200000e+01 : f32
    %300 = vector.broadcast %cst_89 : f32 to vector<16x1xf32>
    %301 = arith.divf %299, %300 : vector<16x1xf32>
    %302 = vector.broadcast %301 : vector<16x1xf32> to vector<16x32xf32>
    %303 = arith.subf %295, %302 : vector<16x32xf32>
    %304 = arith.mulf %303, %303 : vector<16x32xf32>
    %cst_90 = arith.constant dense<0.000000e+00> : vector<16xf32>
    %305 = vector.multi_reduction <add>, %304, %cst_90 [1] : vector<16x32xf32> to vector<16xf32>
    %306 = vector.shape_cast %305 : vector<16xf32> to vector<16x1xf32>
    %cst_91 = arith.constant 3.200000e+01 : f32
    %307 = vector.broadcast %cst_91 : f32 to vector<16x1xf32>
    %308 = arith.divf %306, %307 : vector<16x1xf32>
    %309 = vector.broadcast %301 : vector<16x1xf32> to vector<16x32xf32>
    %310 = arith.subf %295, %309 : vector<16x32xf32>
    %cst_92 = arith.constant 9.99999974E-6 : f32
    %311 = vector.broadcast %cst_92 : f32 to vector<16x1xf32>
    %312 = arith.addf %308, %311 : vector<16x1xf32>
    %313 = math.rsqrt %312 : vector<16x1xf32>
    %314 = vector.broadcast %313 : vector<16x1xf32> to vector<16x32xf32>
    %315 = arith.mulf %310, %314 : vector<16x32xf32>
    %316 = vector.broadcast %296 : vector<1x32xf32> to vector<16x32xf32>
    %317 = arith.mulf %315, %316 : vector<16x32xf32>
    %318 = vector.broadcast %297 : vector<1x32xf32> to vector<16x32xf32>
    %319 = arith.addf %317, %318 : vector<16x32xf32>
    %320 = vector.broadcast %2 : vector<16x1xf32> to vector<16x32xf32>
    %321 = arith.mulf %319, %320 : vector<16x32xf32>
    %c1_93 = arith.constant 1 : index
    %c0_94 = arith.constant 0 : index
    %c0_95 = arith.constant 0 : index
    %322 = vector.load %arg6[%c1_93, %c0_94, %c0_95] : memref<2x32x32xbf16, #tpu.memory_space<vmem>>, vector<1x32x32xbf16>
    %323 = vector.shape_cast %322 : vector<1x32x32xbf16> to vector<32x32xbf16>
    %324 = arith.truncf %321 : vector<16x32xf32> to vector<16x32xbf16>
    %cst_96 = arith.constant dense<0.000000e+00> : vector<16x32xf32>
    %325 = tpu.matmul %324, %323, %cst_96 {dimension_numbers = #tpu.dot_dimension_numbers<[1], [0], [0], [1], [0, 0, 1, 1], [], []>} : vector<16x32xbf16>, vector<32x32xbf16>, vector<16x32xf32> -> vector<16x32xf32>
    %326 = vector.extract_strided_slice %232 {offsets = [4, 0], sizes = [1, 32], strides = [1, 1]} : vector<13x128xf32> to vector<1x32xf32>
    %327 = vector.broadcast %326 : vector<1x32xf32> to vector<16x32xf32>
    %328 = arith.addf %325, %327 : vector<16x32xf32>
    %329 = vector.shape_cast %328 : vector<16x32xf32> to vector<2x8x32xf32>
    %c1_97 = arith.constant 1 : index
    %c0_98 = arith.constant 0 : index
    %c0_99 = arith.constant 0 : index
    %330 = vector.load %arg7[%c1_97, %c0_98, %c0_99] : memref<2x32x64xbf16, #tpu.memory_space<vmem>>, vector<1x32x64xbf16>
    %331 = vector.shape_cast %330 : vector<1x32x64xbf16> to vector<32x64xbf16>
    %332 = arith.truncf %1 : vector<16x32xf32> to vector<16x32xbf16>
    %cst_100 = arith.constant dense<0.000000e+00> : vector<16x64xf32>
    %333 = tpu.matmul %332, %331, %cst_100 {dimension_numbers = #tpu.dot_dimension_numbers<[1], [0], [0], [1], [0, 0, 1, 1], [], []>} : vector<16x32xbf16>, vector<32x64xbf16>, vector<16x64xf32> -> vector<16x64xf32>
    %334 = vector.extract_strided_slice %232 {offsets = [5, 0], sizes = [1, 64], strides = [1, 1]} : vector<13x128xf32> to vector<1x64xf32>
    %335 = vector.broadcast %334 : vector<1x64xf32> to vector<16x64xf32>
    %336 = arith.addf %333, %335 : vector<16x64xf32>
    %337 = vector.extract_strided_slice %336 {offsets = [0, 0], sizes = [16, 32], strides = [1, 1]} : vector<16x64xf32> to vector<16x32xf32>
    %338 = vector.shape_cast %337 : vector<16x32xf32> to vector<2x8x32xf32>
    %339 = vector.extract_strided_slice %336 {offsets = [0, 32], sizes = [16, 32], strides = [1, 1]} : vector<16x64xf32> to vector<16x32xf32>
    %340 = vector.shape_cast %339 : vector<16x32xf32> to vector<2x8x32xf32>
    %341 = vector.extract_strided_slice %329 {offsets = [0, 0, 0], sizes = [2, 8, 16], strides = [1, 1, 1]} : vector<2x8x32xf32> to vector<2x8x16xf32>
    %342 = arith.truncf %341 : vector<2x8x16xf32> to vector<2x8x16xbf16>
    %343 = vector.extract_strided_slice %338 {offsets = [0, 0, 0], sizes = [2, 8, 16], strides = [1, 1, 1]} : vector<2x8x32xf32> to vector<2x8x16xf32>
    %344 = arith.truncf %343 : vector<2x8x16xf32> to vector<2x8x16xbf16>
    %345 = vector.extract_strided_slice %340 {offsets = [0, 0, 0], sizes = [2, 8, 16], strides = [1, 1, 1]} : vector<2x8x32xf32> to vector<2x8x16xf32>
    %346 = arith.truncf %345 : vector<2x8x16xf32> to vector<2x8x16xbf16>
    "tpu.trace_start"() <{level = 10 : i32, message = "bqd,bkd->bqk"}> : () -> ()
    %cst_101 = arith.constant dense<0.000000e+00> : vector<2x8x8xf32>
    %347 = tpu.matmul %342, %344, %cst_101 {dimension_numbers = #tpu.dot_dimension_numbers<[2], [2], [1], [1], [0, 0, 0, 1, 1, 1], [0], [0]>} : vector<2x8x16xbf16>, vector<2x8x16xbf16>, vector<2x8x8xf32> -> vector<2x8x8xf32>
    "tpu.trace_stop"() : () -> ()
    %cst_102 = arith.constant dense<0xFF800000> : vector<2x8xf32>
    %348 = vector.multi_reduction <maximumf>, %347, %cst_102 [2] : vector<2x8x8xf32> to vector<2x8xf32>
    %349 = vector.shape_cast %348 : vector<2x8xf32> to vector<2x8x1xf32>
    %350 = vector.broadcast %349 : vector<2x8x1xf32> to vector<2x8x8xf32>
    %351 = arith.subf %347, %350 : vector<2x8x8xf32>
    %352 = math.exp %351 : vector<2x8x8xf32>
    %cst_103 = arith.constant dense<0.000000e+00> : vector<2x8xf32>
    %353 = vector.multi_reduction <add>, %352, %cst_103 [2] : vector<2x8x8xf32> to vector<2x8xf32>
    %354 = vector.shape_cast %353 : vector<2x8xf32> to vector<2x8x1xf32>
    %355 = tpu.reciprocal %354 {approx = true} : vector<2x8x1xf32> -> vector<2x8x1xf32>
    %356 = vector.broadcast %355 : vector<2x8x1xf32> to vector<2x8x8xf32>
    %357 = arith.mulf %352, %356 : vector<2x8x8xf32>
    %358 = arith.truncf %357 : vector<2x8x8xf32> to vector<2x8x8xbf16>
    "tpu.trace_start"() <{level = 10 : i32, message = "bqk,bkd->bqd"}> : () -> ()
    %cst_104 = arith.constant dense<0.000000e+00> : vector<2x8x16xf32>
    %359 = tpu.matmul %358, %346, %cst_104 {dimension_numbers = #tpu.dot_dimension_numbers<[2], [1], [1], [2], [0, 0, 0, 1, 1, 2], [0], [0]>} : vector<2x8x8xbf16>, vector<2x8x16xbf16>, vector<2x8x16xf32> -> vector<2x8x16xf32>
    "tpu.trace_stop"() : () -> ()
    %360 = vector.extract_strided_slice %329 {offsets = [0, 0, 16], sizes = [2, 8, 16], strides = [1, 1, 1]} : vector<2x8x32xf32> to vector<2x8x16xf32>
    %361 = arith.truncf %360 : vector<2x8x16xf32> to vector<2x8x16xbf16>
    %362 = vector.extract_strided_slice %338 {offsets = [0, 0, 16], sizes = [2, 8, 16], strides = [1, 1, 1]} : vector<2x8x32xf32> to vector<2x8x16xf32>
    %363 = arith.truncf %362 : vector<2x8x16xf32> to vector<2x8x16xbf16>
    %364 = vector.extract_strided_slice %340 {offsets = [0, 0, 16], sizes = [2, 8, 16], strides = [1, 1, 1]} : vector<2x8x32xf32> to vector<2x8x16xf32>
    %365 = arith.truncf %364 : vector<2x8x16xf32> to vector<2x8x16xbf16>
    "tpu.trace_start"() <{level = 10 : i32, message = "bqd,bkd->bqk"}> : () -> ()
    %cst_105 = arith.constant dense<0.000000e+00> : vector<2x8x8xf32>
    %366 = tpu.matmul %361, %363, %cst_105 {dimension_numbers = #tpu.dot_dimension_numbers<[2], [2], [1], [1], [0, 0, 0, 1, 1, 1], [0], [0]>} : vector<2x8x16xbf16>, vector<2x8x16xbf16>, vector<2x8x8xf32> -> vector<2x8x8xf32>
    "tpu.trace_stop"() : () -> ()
    %cst_106 = arith.constant dense<0xFF800000> : vector<2x8xf32>
    %367 = vector.multi_reduction <maximumf>, %366, %cst_106 [2] : vector<2x8x8xf32> to vector<2x8xf32>
    %368 = vector.shape_cast %367 : vector<2x8xf32> to vector<2x8x1xf32>
    %369 = vector.broadcast %368 : vector<2x8x1xf32> to vector<2x8x8xf32>
    %370 = arith.subf %366, %369 : vector<2x8x8xf32>
    %371 = math.exp %370 : vector<2x8x8xf32>
    %cst_107 = arith.constant dense<0.000000e+00> : vector<2x8xf32>
    %372 = vector.multi_reduction <add>, %371, %cst_107 [2] : vector<2x8x8xf32> to vector<2x8xf32>
    %373 = vector.shape_cast %372 : vector<2x8xf32> to vector<2x8x1xf32>
    %374 = tpu.reciprocal %373 {approx = true} : vector<2x8x1xf32> -> vector<2x8x1xf32>
    %375 = vector.broadcast %374 : vector<2x8x1xf32> to vector<2x8x8xf32>
    %376 = arith.mulf %371, %375 : vector<2x8x8xf32>
    %377 = arith.truncf %376 : vector<2x8x8xf32> to vector<2x8x8xbf16>
    "tpu.trace_start"() <{level = 10 : i32, message = "bqk,bkd->bqd"}> : () -> ()
    %cst_108 = arith.constant dense<0.000000e+00> : vector<2x8x16xf32>
    %378 = tpu.matmul %377, %365, %cst_108 {dimension_numbers = #tpu.dot_dimension_numbers<[2], [1], [1], [2], [0, 0, 0, 1, 1, 2], [0], [0]>} : vector<2x8x8xbf16>, vector<2x8x16xbf16>, vector<2x8x16xf32> -> vector<2x8x16xf32>
    "tpu.trace_stop"() : () -> ()
    %379 = tpu.concatenate %359, %378 in 2 : vector<2x8x16xf32>, vector<2x8x16xf32> -> vector<2x8x32xf32>
    %380 = vector.shape_cast %379 : vector<2x8x32xf32> to vector<16x32xf32>
    %c1_109 = arith.constant 1 : index
    %c0_110 = arith.constant 0 : index
    %c0_111 = arith.constant 0 : index
    %381 = vector.load %arg8[%c1_109, %c0_110, %c0_111] : memref<2x32x32xbf16, #tpu.memory_space<vmem>>, vector<1x32x32xbf16>
    %382 = vector.shape_cast %381 : vector<1x32x32xbf16> to vector<32x32xbf16>
    %383 = arith.truncf %380 : vector<16x32xf32> to vector<16x32xbf16>
    %cst_112 = arith.constant dense<0.000000e+00> : vector<16x32xf32>
    %384 = tpu.matmul %383, %382, %cst_112 {dimension_numbers = #tpu.dot_dimension_numbers<[1], [0], [0], [1], [0, 0, 1, 1], [], []>} : vector<16x32xbf16>, vector<32x32xbf16>, vector<16x32xf32> -> vector<16x32xf32>
    %385 = vector.extract_strided_slice %232 {offsets = [6, 0], sizes = [1, 32], strides = [1, 1]} : vector<13x128xf32> to vector<1x32xf32>
    %386 = vector.broadcast %385 : vector<1x32xf32> to vector<16x32xf32>
    %387 = arith.addf %384, %386 : vector<16x32xf32>
    %388 = arith.addf %387, %321 : vector<16x32xf32>
    %389 = vector.extract_strided_slice %232 {offsets = [7, 0], sizes = [1, 32], strides = [1, 1]} : vector<13x128xf32> to vector<1x32xf32>
    %390 = vector.extract_strided_slice %232 {offsets = [8, 0], sizes = [1, 32], strides = [1, 1]} : vector<13x128xf32> to vector<1x32xf32>
    %cst_113 = arith.constant dense<0.000000e+00> : vector<16xf32>
    %391 = vector.multi_reduction <add>, %388, %cst_113 [1] : vector<16x32xf32> to vector<16xf32>
    %392 = vector.shape_cast %391 : vector<16xf32> to vector<16x1xf32>
    %cst_114 = arith.constant 3.200000e+01 : f32
    %393 = vector.broadcast %cst_114 : f32 to vector<16x1xf32>
    %394 = arith.divf %392, %393 : vector<16x1xf32>
    %395 = vector.broadcast %394 : vector<16x1xf32> to vector<16x32xf32>
    %396 = arith.subf %388, %395 : vector<16x32xf32>
    %397 = arith.mulf %396, %396 : vector<16x32xf32>
    %cst_115 = arith.constant dense<0.000000e+00> : vector<16xf32>
    %398 = vector.multi_reduction <add>, %397, %cst_115 [1] : vector<16x32xf32> to vector<16xf32>
    %399 = vector.shape_cast %398 : vector<16xf32> to vector<16x1xf32>
    %cst_116 = arith.constant 3.200000e+01 : f32
    %400 = vector.broadcast %cst_116 : f32 to vector<16x1xf32>
    %401 = arith.divf %399, %400 : vector<16x1xf32>
    %402 = vector.broadcast %394 : vector<16x1xf32> to vector<16x32xf32>
    %403 = arith.subf %388, %402 : vector<16x32xf32>
    %cst_117 = arith.constant 9.99999974E-6 : f32
    %404 = vector.broadcast %cst_117 : f32 to vector<16x1xf32>
    %405 = arith.addf %401, %404 : vector<16x1xf32>
    %406 = math.rsqrt %405 : vector<16x1xf32>
    %407 = vector.broadcast %406 : vector<16x1xf32> to vector<16x32xf32>
    %408 = arith.mulf %403, %407 : vector<16x32xf32>
    %409 = vector.broadcast %389 : vector<1x32xf32> to vector<16x32xf32>
    %410 = arith.mulf %408, %409 : vector<16x32xf32>
    %411 = vector.broadcast %390 : vector<1x32xf32> to vector<16x32xf32>
    %412 = arith.addf %410, %411 : vector<16x32xf32>
    %413 = vector.broadcast %2 : vector<16x1xf32> to vector<16x32xf32>
    %414 = arith.mulf %412, %413 : vector<16x32xf32>
    %c1_118 = arith.constant 1 : index
    %c0_119 = arith.constant 0 : index
    %c0_120 = arith.constant 0 : index
    %415 = vector.load %arg9[%c1_118, %c0_119, %c0_120] : memref<2x32x64xbf16, #tpu.memory_space<vmem>>, vector<1x32x64xbf16>
    %416 = vector.shape_cast %415 : vector<1x32x64xbf16> to vector<32x64xbf16>
    %417 = arith.truncf %414 : vector<16x32xf32> to vector<16x32xbf16>
    %cst_121 = arith.constant dense<0.000000e+00> : vector<16x64xf32>
    %418 = tpu.matmul %417, %416, %cst_121 {dimension_numbers = #tpu.dot_dimension_numbers<[1], [0], [0], [1], [0, 0, 1, 1], [], []>} : vector<16x32xbf16>, vector<32x64xbf16>, vector<16x64xf32> -> vector<16x64xf32>
    %419 = vector.extract_strided_slice %232 {offsets = [9, 0], sizes = [1, 64], strides = [1, 1]} : vector<13x128xf32> to vector<1x64xf32>
    %420 = vector.broadcast %419 : vector<1x64xf32> to vector<16x64xf32>
    %421 = arith.addf %418, %420 : vector<16x64xf32>
    %cst_122 = arith.constant 0.000000e+00 : f32
    %422 = vector.broadcast %cst_122 : f32 to vector<16x64xf32>
    %423 = arith.maximumf %421, %422 : vector<16x64xf32>
    %c1_123 = arith.constant 1 : index
    %c0_124 = arith.constant 0 : index
    %c0_125 = arith.constant 0 : index
    %424 = vector.load %arg10[%c1_123, %c0_124, %c0_125] : memref<2x64x32xbf16, #tpu.memory_space<vmem>>, vector<1x64x32xbf16>
    %425 = vector.shape_cast %424 : vector<1x64x32xbf16> to vector<64x32xbf16>
    %426 = arith.truncf %423 : vector<16x64xf32> to vector<16x64xbf16>
    %cst_126 = arith.constant dense<0.000000e+00> : vector<16x32xf32>
    %427 = tpu.matmul %426, %425, %cst_126 {dimension_numbers = #tpu.dot_dimension_numbers<[1], [0], [0], [1], [0, 0, 1, 1], [], []>} : vector<16x64xbf16>, vector<64x32xbf16>, vector<16x32xf32> -> vector<16x32xf32>
    %428 = vector.extract_strided_slice %232 {offsets = [10, 0], sizes = [1, 32], strides = [1, 1]} : vector<13x128xf32> to vector<1x32xf32>
    %429 = vector.broadcast %428 : vector<1x32xf32> to vector<16x32xf32>
    %430 = arith.addf %427, %429 : vector<16x32xf32>
    %431 = arith.addf %430, %414 : vector<16x32xf32>
    %432 = vector.extract_strided_slice %232 {offsets = [11, 0], sizes = [1, 32], strides = [1, 1]} : vector<13x128xf32> to vector<1x32xf32>
    %433 = vector.extract_strided_slice %232 {offsets = [12, 0], sizes = [1, 32], strides = [1, 1]} : vector<13x128xf32> to vector<1x32xf32>
    %cst_127 = arith.constant dense<0.000000e+00> : vector<16xf32>
    %434 = vector.multi_reduction <add>, %431, %cst_127 [1] : vector<16x32xf32> to vector<16xf32>
    %435 = vector.shape_cast %434 : vector<16xf32> to vector<16x1xf32>
    %cst_128 = arith.constant 3.200000e+01 : f32
    %436 = vector.broadcast %cst_128 : f32 to vector<16x1xf32>
    %437 = arith.divf %435, %436 : vector<16x1xf32>
    %438 = vector.broadcast %437 : vector<16x1xf32> to vector<16x32xf32>
    %439 = arith.subf %431, %438 : vector<16x32xf32>
    %440 = arith.mulf %439, %439 : vector<16x32xf32>
    %cst_129 = arith.constant dense<0.000000e+00> : vector<16xf32>
    %441 = vector.multi_reduction <add>, %440, %cst_129 [1] : vector<16x32xf32> to vector<16xf32>
    %442 = vector.shape_cast %441 : vector<16xf32> to vector<16x1xf32>
    %cst_130 = arith.constant 3.200000e+01 : f32
    %443 = vector.broadcast %cst_130 : f32 to vector<16x1xf32>
    %444 = arith.divf %442, %443 : vector<16x1xf32>
    %445 = vector.broadcast %437 : vector<16x1xf32> to vector<16x32xf32>
    %446 = arith.subf %431, %445 : vector<16x32xf32>
    %cst_131 = arith.constant 9.99999974E-6 : f32
    %447 = vector.broadcast %cst_131 : f32 to vector<16x1xf32>
    %448 = arith.addf %444, %447 : vector<16x1xf32>
    %449 = math.rsqrt %448 : vector<16x1xf32>
    %450 = vector.broadcast %449 : vector<16x1xf32> to vector<16x32xf32>
    %451 = arith.mulf %446, %450 : vector<16x32xf32>
    %452 = vector.broadcast %432 : vector<1x32xf32> to vector<16x32xf32>
    %453 = arith.mulf %451, %452 : vector<16x32xf32>
    %454 = vector.broadcast %433 : vector<1x32xf32> to vector<16x32xf32>
    %455 = arith.addf %453, %454 : vector<16x32xf32>
    %456 = vector.broadcast %2 : vector<16x1xf32> to vector<16x32xf32>
    %457 = arith.mulf %455, %456 : vector<16x32xf32>
    %c0_132 = arith.constant 0 : index
    %c0_133 = arith.constant 0 : index
    %458 = vector.load %arg12[%c0_132, %c0_133] : memref<32x128xbf16, #tpu.memory_space<vmem>>, vector<32x128xbf16>
    %459 = arith.truncf %457 : vector<16x32xf32> to vector<16x32xbf16>
    %cst_134 = arith.constant dense<0.000000e+00> : vector<16x128xf32>
    %460 = tpu.matmul %459, %458, %cst_134 {dimension_numbers = #tpu.dot_dimension_numbers<[1], [0], [0], [1], [0, 0, 1, 1], [], []>} : vector<16x32xbf16>, vector<32x128xbf16>, vector<16x128xf32> -> vector<16x128xf32>
    %c0_135 = arith.constant 0 : index
    %c0_136 = arith.constant 0 : index
    %461 = vector.load %arg13[%c0_135, %c0_136] : memref<16x128xf32, #tpu.memory_space<vmem>>, vector<16x128xf32>
    tpu.vector_store %arg13[%c0_135, %c0_136], %460 {strides = array<i32>} : memref<16x128xf32, #tpu.memory_space<vmem>>, vector<16x128xf32>,
    return
  }
}

</mosaic_0001>

<bundles_post_ra>
// kernel: tpu_custom_call.1
= control target key start
LH: loop header
LB: loop body
LE: loop exit
PB: predicated region body
PF: predicated region fallthrough
CT: control target
= control target key end

     0   :  { %18 = vsyncpa [#allocation3], 0  ;;  %s3066_s0 = inlined_call_operand.hbm [shape: f32[16,32], index: 0, kind: input, shape index: {}]   ;;  %s3067_s1 = inlined_call_operand.hbm [shape: f32[16,32], index: 1, kind: input, shape index: {}]   ;;  %s3068_s2 = inlined_call_operand.vmem [shape: f32[16,1], index: 2, kind: input, shape index: {}]   ;;  %s3069_s3 = inlined_call_operand.hbm [shape: f32[2,8,8], index: 3, kind: input, shape index: {}]   ;;  %s3070_s4 = inlined_call_operand.vmem [shape: bf16[2,32,96], index: 4, kind: input, shape index: {}]   ;;  %s3071_s5 = inlined_call_operand.vmem [shape: bf16[2,32,32], index: 5, kind: input, shape index: {}]   ;;  %s3072_s6 = inlined_call_operand.vmem [shape: bf16[2,32,32], index: 6, kind: input, shape index: {}]   ;;  %s3073_s7 = inlined_call_operand.vmem [shape: bf16[2,32,64], index: 7, kind: input, shape index: {}]   ;;  %s3074_s8 = inlined_call_operand.vmem [shape: bf16[2,32,32], index: 8, kind: input, shape index: {}]   ;;  %s3075_s9 = inlined_call_operand.hbm [shape: bf16[2,32,64], index: 9, kind: input, shape index: {}]   ;;  %s3076_s10 = inlined_call_operand.vmem [shape: bf16[2,64,32], index: 10, kind: input, shape index: {}]   ;;  %s3077_s11 = inlined_call_operand.vmem [shape: f32[2,13,128], index: 11, kind: input, shape index: {}]   ;;  %s3078_s12 = inlined_call_operand.vmem [shape: bf16[32,128], index: 12, kind: input, shape index: {}]   ;;  %s3079_s13 = inlined_call_operand.hbm [shape: f32[16,128], index: 13, kind: output, shape index: {}]  }
   0x1   :  { %19 = vsyncpa [#allocation6], 0 }
   0x2   :  { %20 = vsyncpa [#allocation9], 0 }
   0x3   :  { %21 = vsyncpa [#allocation4], 0  ;;  %s39_s27 = sshll.u32 %s3067_s1, 4  ;;  %s2519_s28 = smov [#allocation5]   ;;  %s40_s27 = int_to_ptr.hbm [resolvable:$true] %s39_s27 }
   0x4   :  { %s41_s29 = sshll.u32 %s2519_s28, 4  ;;  %s26_s15 = sshll.u32 %s3066_s0, 4  ;;  %s42_s29 = int_to_ptr.vmem [resolvable:$true] %s41_s29  ;;  %s27_s15 = int_to_ptr.hbm [resolvable:$true] %s26_s15 }
   0x5   :  { %s2520_s16 = smov 128   ;;  %s2521_s17 = smov 8  }
   0x6   :  { %47 = dma.hbm_to_vmem [thread:$0]  %s40_s27, 256, %s42_s29, [#allocation6], %s2520_s16, %s2520_s16, %s2521_s17  }
   0x7   :  { %s2522_s18 = smov [#allocation2]   ;;  %s54_s1 = sshll.u32 %s3069_s3, 4  ;;  %s55_s1 = int_to_ptr.hbm [resolvable:$true] %s54_s1 }
   0x8   :  { %s28_s19 = sshll.u32 %s2522_s18, 4  ;;  %s77_s23 = sshll.u32 %s3075_s9, 4  ;;  %s29_s19 = int_to_ptr.vmem [resolvable:$true] %s28_s19  ;;  %s78_s23 = int_to_ptr.hbm [resolvable:$true] %s77_s23 }
   0x9   :  { %34 = dma.hbm_to_vmem [thread:$0]  %s27_s15, 256, %s29_s19, [#allocation3], %s2520_s16, %s2520_s16, %s2521_s17  }
   0xa   :  { %s2523_s24 = smov [#allocation7]   ;;  %s2524_s26 = smov [#allocation8]  }
   0xb   :  { %s56_s25 = sshll.u32 %s2523_s24, 4  ;;  %s79_s3 = sshll.u32 %s2524_s26, 4  ;;  %s57_s25 = int_to_ptr.vmem [resolvable:$true] %s56_s25  ;;  %s80_s3 = int_to_ptr.vmem [resolvable:$true] %s79_s3 }
   0xc   :  { %62 = dma.hbm_to_vmem [thread:$0]  %s55_s1, 256, %s57_s25, [#allocation6], %s2520_s16, %s2520_s16, %s2521_s17  }
   0xd   :  { %s2525_s27 = smov 64   ;;  %s2526_s28 = smov 4  }
   0xe   :  { %85 = dma.hbm_to_vmem [thread:$0]  %s78_s23, 512, %s80_s3, [#allocation9], %s2525_s27, %s2525_s27, %s2526_s28  }
   0xf   :  { %2511 = dma.done.wait [#allocation3], 256  }
  0x10   :  { %2512 = vsyncadd [#allocation3], 4294967040 }
  0x11   :  { %2513 = dma.done.wait [#allocation6], 512  }
  0x12   :  { %2514 = vsyncadd [#allocation6], 4294966784 }
  0x13   :  { %2515 = dma.done.wait [#allocation9], 512  }
  0x14   :  { %2516 = vsyncadd [#allocation9], 4294966784  ;;  %v2228_v0 = vld [vmem:[%s3070_s4 + $0x8] sm:$0xff]  ;;  %v2227_v1 = vld [vmem:[%s3070_s4] sm:$0xff]  ;;  %vm137_vm0 = vcmask 261120   ;;  %s2527_s19 = smov 112  }
  0x15   :  { %147 = vmatpush.bf16.msra.mxu0 %v2228_v0  ;;  %v2634_v2 = vld [vmem:[#allocation2] sm:$0xff]  ;;  %v2636_v3 = vld [vmem:[#allocation2 + $0x8] sm:$0xff]  ;;  %s2528_s20 = smov 80   ;;  %s2529_s21 = smov 96   ;;  %vm162_vm1 = vcmask 130048   ;;  %vm206_vm2 = vcmask 64512  }
  0x16   :  { %v123_v4 = vpack.c.bf16 %v2636_v3, %v2634_v2  ;;  %v2644_v5 = vld [vmem:[%s3077_s11] sm:$0xff]  ;;  %v116_v36 = vld [vmem:[#allocation7 + $0x8] sm:$0xff]  ;;  %s2530_s1 = smov 48   ;;  %vm236_vm3 = vcmask 1043456   ;;  %s2531_s23 = smov 16  }
  0x17   :  { %v124_v6 = vperm.slane %v2644_v5, 0  ;;  %v115_v27 = vld [vmem:[#allocation7] sm:$0xff]  ;;  %s1999_s14 = sshll.u32 %s3079_s13, 4  ;;  %s2000_s14 = int_to_ptr.hbm [resolvable:$true] %s1999_s14 }
  0x19   :  { %148 = vmatpush.bf16.msra.mxu0 %v2227_v1 }
  0x1c   :  { %2022 = vmatmul.msk.bf16.vlgmr.msra.gmra.mxu0 %vm137_vm0, %v123_v4 }
  0x99   :  { %v150_v7 = vpop.f32.mrf.mxu0 }
  0x9a   :  { %v151_v8 = vadd.f32 %v150_v7, %v124_v6 }
  0x9c   :  { %v155_v9 = vpack.c.bf16 %v151_v8, %v151_v8 }
  0x9e   :  { %v158_v10 = vunpack.c.l.b16 %v155_v9 }
  0xa0   :  { %v159_v11 = vpack.c.b16 %v158_v10, %v158_v10 }
  0xa1   :  { %v152_v12 = vpop.f32.mrf.mxu0 }
  0xa2   :  { %v153_v13 = vadd.f32 %v152_v12, %v124_v6  ;;  %274 = vrot.lane.b32.xlu2 %v159_v11, %s2527_s19  ;;  %276 = vrot.lane.b32.xlu1 %v159_v11, %s2528_s20 }
  0xa3   :  { %160 = vrot.lane.b32.xlu0 %v159_v11, %s2529_s21 }
  0xa4   :  { %v156_v14 = vpack.c.bf16 %v153_v13, %v153_v13 }
  0xa6   :  { %v183_v15 = vunpack.c.l.b16 %v156_v14 }
  0xa8   :  { %v2650_v16 = vpack.c.b16 %v183_v15, %v183_v15 }
  0xaa   :  { %297 = vrot.lane.b32.xlu2 %v2650_v16, %s2527_s19  ;;  %299 = vrot.lane.b32.xlu1 %v2650_v16, %s2528_s20 }
  0xab   :  { %185 = vrot.lane.b32.xlu0 %v2650_v16, %s2529_s21 }
  0xfc   :  { %v275_v21 = vpop.permute.xlu2 %274 }
 0x104   :  { %v298_v26 = vpop.permute.xlu2 %297 }
 0x114   :  { %v277_v17 = vpop.permute.xlu1 %276 }
 0x115   :  { %v161_v18 = vpop.permute.xlu0 %160  ;;  %v282_v19 = vsel %vm162_vm1, %v277_v17, 0 }
 0x116   :  { %v167_v20 = vsel %vm162_vm1, %v161_v18, 0  ;;  %291 = vmatpush.bf16.xpose.msrb.mxu0 %v282_v19 }
 0x117   :  { %176 = vmatpush.bf16.xpose.msra.mxu1 %v167_v20 }
 0x11c   :  { %v300_v22 = vpop.permute.xlu1 %299 }
 0x11d   :  { %v186_v23 = vpop.permute.xlu0 %185  ;;  %2027 = vmatmul.msk.bf16.vlgmr.msrb.gmra.mxu0 %vm162_vm1, %v275_v21  ;;  %v305_v24 = vsel %vm162_vm1, %v300_v22, 0 }
 0x11e   :  { %2023 = vmatmul.msk.bf16.vlgmr.msra.gmra.mxu1 %vm162_vm1, %v155_v9  ;;  %v191_v25 = vsel %vm162_vm1, %v186_v23, 0 }
 0x11f   :  { %200 = vmatpush.bf16.xpose.msra.mxu2 %v191_v25  ;;  %314 = vmatpush.bf16.xpose.msrb.mxu1 %v305_v24 }
 0x126   :  { %2024 = vmatmul.msk.bf16.vlgmr.msra.gmra.mxu2 %vm162_vm1, %v156_v14 }
 0x12e   :  { %2028 = vmatmul.msk.bf16.vlgmr.msrb.gmra.mxu1 %vm162_vm1, %v298_v26 }
 0x19a   :  { %v293_v28 = vpop.f32.mrf.mxu0 }
 0x19b   :  { %v178_v29 = vpop.f32.mrf.mxu1  ;;  %v294_v30 = vadd.f32 %v293_v28, %v115_v27 }
 0x19c   :  { %v179_v31 = vadd.f32 %v178_v29, %v115_v27 }
 0x19d   :  { %v320_v32 = vsel %vm206_vm2, %v294_v30, -inf }
 0x19e   :  { %321 = vmax.xlane.f32.xlu2 %v320_v32  ;;  %v207_v33 = vsel %vm206_vm2, %v179_v31, -inf }
 0x19f   :  { %208 = vmax.xlane.f32.xlu0 %v207_v33 }
 0x1a2   :  { %v295_v34 = vpop.f32.mrf.mxu0 }
 0x1a3   :  { %v180_v35 = vpop.f32.mrf.mxu1 }
 0x1a9   :  { %v202_v37 = vpop.f32.mrf.mxu2 }
 0x1aa   :  { %v203_v38 = vadd.f32 %v202_v37, %v116_v36 }
 0x1ab   :  { %v316_v39 = vpop.f32.mrf.mxu1 }
 0x1ac   :  { %v317_v40 = vadd.f32 %v316_v39, %v116_v36  ;;  %v210_v41 = vsel %vm206_vm2, %v203_v38, -inf }
 0x1ad   :  { %211 = vmax.xlane.f32.xlu1 %v210_v41 }
 0x1ae   :  { %v323_v42 = vsel %vm206_vm2, %v317_v40, -inf }
 0x1af   :  { %324 = vmax.xlane.f32.xlu2 %v323_v42 }
 0x1b1   :  { %v204_v43 = vpop.f32.mrf.mxu2 }
 0x1b3   :  { %v318_v44 = vpop.f32.mrf.mxu1  ;;  %253 = vrot.lane.b32.xlu0 %v2650_v16, %s2525_s27 }
 0x1c6   :  { %231 = vrot.lane.b32.xlu1 %v159_v11, %s2525_s27 }
 0x1ce   :  { %344 = vrot.lane.b32.xlu1 %v159_v11, %s2530_s1 }
 0x211   :  { %v322_v50 = vpop.xlane.xlu2 %321 }
 0x212   :  { %v209_v45 = vpop.xlane.xlu0 %208  ;;  %v326_v53 = vsub.f32 %v294_v30, %v322_v50  ;;  %v2230_v30 = vld [vmem:[%s3071_s5 + $0x8] sm:$0xff] }
 0x213   :  { %v213_v46 = vsub.f32 %v179_v31, %v209_v45  ;;  %423 = vmatpush.bf16.msra.mxu0 %v2230_v30  ;;  %v401_v45 = vperm.slane %v2644_v5, 1 }
 0x214   :  { %v328_v55 = vmul.f32 1.442695, %v326_v53 }
 0x215   :  { %v215_v47 = vmul.f32 1.442695, %v213_v46 }
 0x217   :  { %2299 = vpow2.f32 %v215_v47 }
 0x21d   :  { %v2300_v48 = vpop.eup %2299 }
 0x21e   :  { %v219_v49 = vsel %vm206_vm2, %v2300_v48, 0.0 }
 0x21f   :  { %220 = vadd.xlane.f32.xlu0 %v219_v49 }
 0x220   :  { %v212_v51 = vpop.xlane.xlu1 %211 }
 0x221   :  { %v214_v52 = vsub.f32 %v203_v38, %v212_v51  ;;  %v2229_v38 = vld [vmem:[%s3071_s5] sm:$0xff] }
 0x222   :  { %v325_v56 = vpop.xlane.xlu2 %324  ;;  %424 = vmatpush.bf16.msra.mxu0 %v2229_v38 }
 0x223   :  { %v217_v54 = vmul.f32 1.442695, %v214_v52  ;;  %v327_v58 = vsub.f32 %v317_v40, %v325_v56 }
 0x225   :  { %2301 = vpow2.f32 %v217_v54  ;;  %v330_v60 = vmul.f32 1.442695, %v327_v58  ;;  %v254_v63 = vpop.permute.xlu0 %253  ;;  %v2532_v54 = vmov 32.0   ;;  %v2533_v58 = vmov 0  }
 0x226   :  { %2303 = vpow2.f32 %v328_v55  ;;  %v259_v6 = vsel %vm236_vm3, %v254_v63, 0  ;;  %2282 = vset.pattern.permute.xlu0 %v2533_v58  ;;  %2283 = vset.pattern.permute.xlu1 %v2533_v58 }
 0x227   :  { %2305 = vpow2.f32 %v330_v60 }
 0x22b   :  { %v2302_v57 = vpop.eup %2301 }
 0x22c   :  { %v222_v59 = vsel %vm206_vm2, %v2302_v57, 0.0  ;;  %v2304_v61 = vpop.eup %2303 }
 0x22d   :  { %223 = vadd.xlane.f32.xlu2 %v222_v59  ;;  %v332_v62 = vsel %vm206_vm2, %v2304_v61, 0.0  ;;  %v2306_v1 = vpop.eup %2305 }
 0x22e   :  { %v335_v7 = vsel %vm206_vm2, %v2306_v1, 0.0 }
 0x233   :  { %365 = vrot.lane.b32.xlu0 %v2650_v16, %s2530_s1 }
 0x235   :  { %333 = vadd.xlane.f32.xlu2 %v332_v62 }
 0x238   :  { %v232_v0 = vpop.permute.xlu1 %231 }
 0x239   :  { %v238_v4 = vsel %vm236_vm3, %v232_v0, 0 }
 0x23a   :  { %247 = vmatpush.bf16.msra.mxu3 %v238_v4 }
 0x23d   :  { %336 = vadd.xlane.f32.xlu2 %v335_v7 }
 0x23e   :  { %268 = vmatpush.bf16.msrb.mxu3 %v259_v6 }
 0x240   :  { %v345_v8 = vpop.permute.xlu1 %344 }
 0x241   :  { %v350_v9 = vsel %vm236_vm3, %v345_v8, 0 }
 0x242   :  { %359 = vmatpush.bf16.msrb.mxu2 %v350_v9 }
 0x292   :  { %v221_v10 = vpop.xlane.xlu0 %220 }
 0x293   :  { %2307 = vrcp.f32 %v221_v10  ;;  %v114_v10 = vld [vmem:[%s3068_s2 + $0x8] sm:$0xff] }
 0x299   :  { %v2308_v11 = vpop.eup %2307 }
 0x29a   :  { %v227_v12 = vmul.f32 %v2308_v11, %v2300_v48  ;;  %v2234_v11 = vld [vmem:[%s3073_s7 + $0x8] sm:$0xff] }
 0x29b   :  { %564 = vmatpush.bf16.msra.mxu2 %v2234_v11 }
 0x29c   :  { %v229_v13 = vpack.c.bf16 %v227_v12, %v227_v12  ;;  %v2233_v12 = vld [vmem:[%s3073_s7] sm:$0xff] }
 0x29e   :  { %2025 = vmatmul.msk.bf16.vlgmr.msra.gmra.mxu3 %vm206_vm2, %v229_v13  ;;  %v111_v13 = vld [vmem:[#allocation5] sm:$0xff] }
 0x29f   :  { %565 = vmatpush.bf16.msra.mxu2 %v2233_v12 }
 0x2a0   :  { %v224_v14 = vpop.xlane.xlu2 %223 }
 0x2a1   :  { %2309 = vrcp.f32 %v224_v14  ;;  %v112_v14 = vld [vmem:[#allocation5 + $0x8] sm:$0xff] }
 0x2a5   :  { %v366_v15 = vpop.permute.xlu0 %365 }
 0x2a6   :  { %v371_v16 = vsel %vm236_vm3, %v366_v15, 0  ;;  %v2721_v15 = vpack.c.bf16 %v112_v14, %v111_v13 }
 0x2a7   :  { %v2310_v17 = vpop.eup %2309  ;;  %380 = vmatpush.bf16.msra.mxu3 %v371_v16 }
 0x2a8   :  { %v228_v18 = vmul.f32 %v2310_v17, %v2302_v57  ;;  %v334_v19 = vpop.xlane.xlu2 %333  ;;  %v113_v57 = vld [vmem:[%s3068_s2] sm:$0xff]  ;;  %v2232_v17 = vld [vmem:[%s3072_s6 + $0x8] sm:$0xff] }
 0x2a9   :  { %2311 = vrcp.f32 %v334_v19  ;;  %529 = vmatpush.bf16.msra.mxu1 %v2232_v17 }
 0x2aa   :  { %v230_v20 = vpack.c.bf16 %v228_v18, %v228_v18 }
 0x2ae   :  { %2026 = vmatmul.msk.bf16.vlgmr.msrb.gmra.mxu3 %vm206_vm2, %v230_v20  ;;  %v2231_v20 = vld [vmem:[%s3072_s6] sm:$0xff] }
 0x2af   :  { %v2312_v21 = vpop.eup %2311  ;;  %530 = vmatpush.bf16.msra.mxu1 %v2231_v20 }
 0x2b0   :  { %v340_v22 = vmul.f32 %v2312_v21, %v2304_v61  ;;  %v337_v23 = vpop.xlane.xlu2 %336 }
 0x2b1   :  { %2313 = vrcp.f32 %v337_v23 }
 0x2b2   :  { %v342_v24 = vpack.c.bf16 %v340_v22, %v340_v22  ;;  %2315 = vrcp.f32 %v2532_v54 }
 0x2b4   :  { %2029 = vmatmul.msk.bf16.vlgmr.msrb.gmra.mxu2 %vm206_vm2, %v342_v24 }
 0x2b7   :  { %v2314_v25 = vpop.eup %2313 }
 0x2b8   :  { %v341_v26 = vmul.f32 %v2314_v25, %v2306_v1  ;;  %v2316_v55 = vpop.eup %2315 }
 0x2b9   :  { %v440_v56 = vmul.f32 32.0, %v2316_v55  ;;  %vm444_vm4 = vweird.f32 %v2316_v55 }
 0x2ba   :  { %v343_v27 = vpack.c.bf16 %v341_v26, %v341_v26 }
 0x2be   :  { %2030 = vmatmul.msk.bf16.vlgmr.msra.gmra.mxu3 %vm206_vm2, %v343_v27 }
 0x2c4   :  { %2057 = vmatmul.msk.bf16.vlgmr.msra.gmra.mxu2 %vm137_vm0, %v2721_v15 }
 0x321   :  { %v249_v28 = vpop.f32.mrf.mxu3 }
 0x329   :  { %v251_v29 = vpop.f32.mrf.mxu3 }
 0x331   :  { %v270_v31 = vpop.f32.mrf.mxu3 }
 0x337   :  { %v361_v32 = vpop.f32.mrf.mxu2 }
 0x339   :  { %v272_v33 = vpop.f32.mrf.mxu3 }
 0x33f   :  { %v363_v34 = vpop.f32.mrf.mxu2 }
 0x341   :  { %v382_v35 = vpop.f32.mrf.mxu3 }
 0x342   :  { %v2277_v36 = vpack.i.bf16 %v382_v35, %v361_v32  ;;  %v484_v35 = vperm.slane %v2644_v5, 2 }
 0x344   :  { %2278 = vrot.lane.b32.xlu2 %v2277_v36, %s2531_s23 }
 0x349   :  { %v384_v37 = vpop.f32.mrf.mxu3 }
 0x39e   :  { %v2279_v39 = vpop.permute.xlu2 %2278 }
 0x39f   :  { %v2281_v40 = vunpack.i.h.bf16 %v2279_v39  ;;  %v2280_v41 = vunpack.i.l.bf16 %v2279_v39 }
 0x3a1   :  { %v395_v42 = vsel %vm162_vm1, %v270_v31, %v2281_v40  ;;  %v394_v43 = vsel %vm162_vm1, %v249_v28, %v2280_v41  ;;  %v487_v40 = vperm.slane %v2644_v5, 3 }
 0x3a2   :  { %v400_v44 = vpack.c.bf16 %v395_v42, %v394_v43 }
 0x3a4   :  { %2039 = vmatmul.msk.bf16.vlgmr.msra.gmra.mxu0 %vm137_vm0, %v400_v44 }
 0x421   :  { %v426_v46 = vpop.f32.mrf.mxu0 }
 0x422   :  { %v427_v47 = vadd.f32 %v426_v46, %v401_v45 }
 0x424   :  { %v431_v48 = vadd.f32 %v427_v47, %v2634_v2  ;;  %v441_v2 = vsub.f32 1.0, %v440_v56 }
 0x426   :  { %v433_v49 = vsel %vm137_vm0, %v431_v48, 0.0  ;;  %v442_v59 = vmul.f32 %v2316_v55, %v441_v2 }
 0x427   :  { %434 = vadd.xlane.f32.xlu1 %v433_v49 }
 0x428   :  { %v443_v60 = vadd.f32 %v2316_v55, %v442_v59 }
 0x429   :  { %v428_v50 = vpop.f32.mrf.mxu0 }
 0x42a   :  { %v429_v51 = vadd.f32 %v428_v50, %v401_v45 }
 0x42c   :  { %v432_v52 = vadd.f32 %v429_v51, %v2636_v3  ;;  %v2706_v3 = vsel %vm444_vm4, %v2316_v55, %v443_v60  ;;  %v542_v51 = vperm.slane %v2644_v5, 5 }
 0x42e   :  { %v436_v53 = vsel %vm137_vm0, %v432_v52, 0.0 }
 0x42f   :  { %437 = vadd.xlane.f32.xlu0 %v436_v53 }
 0x443   :  { %492 = vperm.xlu0 %2282, %v113_v57  }
 0x49a   :  { %v435_v61 = vpop.xlane.xlu1 %434 }
 0x49b   :  { %v446_v62 = vmul.f32 %v2706_v3, %v435_v61 }
 0x49d   :  { %v448_v63 = vsub.f32 %v431_v48, %v446_v62 }
 0x49f   :  { %v450_v0 = vmul.f32 %v448_v63, %v448_v63 }
 0x4a1   :  { %v452_v1 = vsel %vm137_vm0, %v450_v0, 0.0 }
 0x4a2   :  { %v438_v4 = vpop.xlane.xlu0 %437  ;;  %453 = vadd.xlane.f32.xlu2 %v452_v1 }
 0x4a3   :  { %v447_v6 = vmul.f32 %v2706_v3, %v438_v4 }
 0x4a5   :  { %v449_v7 = vsub.f32 %v432_v52, %v447_v6  ;;  %v567_v52 = vpop.f32.mrf.mxu2 }
 0x4a6   :  { %v568_v53 = vadd.f32 %v567_v52, %v542_v51 }
 0x4a7   :  { %v451_v8 = vmul.f32 %v449_v7, %v449_v7 }
 0x4a8   :  { %v574_v54 = vpack.c.bf16 %v568_v53, %v568_v53 }
 0x4a9   :  { %v455_v9 = vsel %vm137_vm0, %v451_v8, 0.0 }
 0x4aa   :  { %456 = vadd.xlane.f32.xlu1 %v455_v9  ;;  %v580_v55 = vsel %vm162_vm1, %v574_v54, 0  ;;  %v639_v56 = vunpack.c.l.b16 %v574_v54 }
 0x4ab   :  { %589 = vmatpush.bf16.xpose.msrb.mxu3 %v580_v55 }
 0x4ac   :  { %v2750_v57 = vpack.c.b16 %v639_v56, %v639_v56 }
 0x4ad   :  { %v569_v58 = vpop.f32.mrf.mxu2 }
 0x4ae   :  { %v570_v2 = vadd.f32 %v569_v58, %v542_v51 }
 0x4b0   :  { %v575_v59 = vpack.c.bf16 %v570_v2, %v570_v2 }
 0x4b2   :  { %v599_v60 = vsel %vm162_vm1, %v575_v59, 0  ;;  %v663_v61 = vunpack.c.l.b16 %v575_v59 }
 0x4b3   :  { %608 = vmatpush.bf16.xpose.msrb.mxu0 %v599_v60 }
 0x4b4   :  { %v2755_v62 = vpack.c.b16 %v663_v61, %v663_v61 }
 0x4b5   :  { %v2735_v45 = vpop.permute.xlu0 %492 }
 0x4ba   :  { %691 = vrot.lane.b32.xlu2 %v2750_v57, %s2527_s19 }
 0x4c3   :  { %497 = vperm.xlu1 %2283, %v114_v10  }
 0x4cb   :  { %717 = vrot.lane.b32.xlu1 %v2755_v62, %s2527_s19 }
 0x515   :  { %v454_v16 = vpop.xlane.xlu2 %453 }
 0x516   :  { %v458_v18 = vmul.f32 %v454_v16, %v2706_v3 }
 0x518   :  { %v460_v19 = vadd.f32 1e-05, %v458_v18 }
 0x51a   :  { %2317 = vrsqrt.f32 %v460_v19  ;;  %vm468_vm6 = vweird.f32 %v460_v19 }
 0x51d   :  { %v457_v21 = vpop.xlane.xlu1 %456  ;;  %v692_v13 = vpop.permute.xlu2 %691 }
 0x51e   :  { %v459_v22 = vmul.f32 %v457_v21, %v2706_v3  ;;  %v697_v14 = vsel %vm162_vm1, %v692_v13, 0 }
 0x51f   :  { %706 = vmatpush.bf16.xpose.msra.mxu3 %v697_v14 }
 0x520   :  { %v2318_v23 = vpop.eup %2317  ;;  %v461_v24 = vadd.f32 1e-05, %v459_v22 }
 0x521   :  { %v463_v25 = vmul.f32 %v2318_v23, %v460_v19  ;;  %vm469_vm5 = vweird.f32 %v2318_v23 }
 0x522   :  { %2319 = vrsqrt.f32 %v461_v24  ;;  %vm470_vm7 = vmor %vm468_vm6, %vm469_vm5  ;;  %vm478_vm9 = vweird.f32 %v461_v24  ;;  %vm974_vm5 = vcmask 523264  }
 0x523   :  { %v464_v26 = vmul.f32 %v2318_v23, %v463_v25 }
 0x525   :  { %v465_v27 = vmul.f32 0.5, %v464_v26 }
 0x527   :  { %v466_v28 = vsub.f32 1.5, %v465_v27 }
 0x528   :  { %v2320_v29 = vpop.eup %2319 }
 0x529   :  { %v467_v30 = vmul.f32 %v2318_v23, %v466_v28  ;;  %v473_v31 = vmul.f32 %v2320_v29, %v461_v24  ;;  %vm479_vm8 = vweird.f32 %v2320_v29 }
 0x52a   :  { %vm480_vm10 = vmor %vm478_vm9, %vm479_vm8 }
 0x52b   :  { %v471_v32 = vsel %vm470_vm7, %v2318_v23, %v467_v30  ;;  %v474_v33 = vmul.f32 %v2320_v29, %v473_v31 }
 0x52c   :  { %v482_v36 = vmul.f32 %v471_v32, %v448_v63  ;;  %v507_v63 = vperm.slane %v2644_v5, 4 }
 0x52d   :  { %v475_v34 = vmul.f32 0.5, %v474_v33 }
 0x52e   :  { %v485_v39 = vmul.f32 %v484_v35, %v482_v36 }
 0x52f   :  { %v476_v37 = vsub.f32 1.5, %v475_v34 }
 0x530   :  { %v488_v44 = vadd.f32 %v487_v40, %v485_v39 }
 0x531   :  { %v477_v38 = vmul.f32 %v2320_v29, %v476_v37 }
 0x532   :  { %v2740_v48 = vmul.f32 %v2735_v45, %v488_v44 }
 0x533   :  { %v481_v41 = vsel %vm480_vm10, %v2320_v29, %v477_v38 }
 0x534   :  { %v483_v42 = vmul.f32 %v481_v41, %v449_v7 }
 0x535   :  { %v2737_v46 = vpop.permute.xlu1 %497 }
 0x536   :  { %v486_v43 = vmul.f32 %v484_v35, %v483_v42 }
 0x538   :  { %v489_v47 = vadd.f32 %v487_v40, %v486_v43 }
 0x53a   :  { %v2743_v49 = vmul.f32 %v2737_v46, %v489_v47 }
 0x53c   :  { %v506_v50 = vpack.c.bf16 %v2743_v49, %v2740_v48 }
 0x53d   :  { %v718_v16 = vpop.permute.xlu1 %717 }
 0x53e   :  { %2048 = vmatmul.msk.bf16.vlgmr.msra.gmra.mxu1 %vm137_vm0, %v506_v50  ;;  %v723_v17 = vsel %vm162_vm1, %v718_v16, 0 }
 0x53f   :  { %732 = vmatpush.bf16.xpose.msra.mxu0 %v723_v17 }
 0x5bb   :  { %v532_v0 = vpop.f32.mrf.mxu1 }
 0x5bc   :  { %v533_v1 = vadd.f32 %v532_v0, %v507_v63 }
 0x5be   :  { %v572_v4 = vpack.c.bf16 %v533_v1, %v533_v1 }
 0x5c0   :  { %v687_v6 = vunpack.c.l.b16 %v572_v4  ;;  %2058 = vmatmul.msk.bf16.vlgmr.msrb.gmra.mxu3 %vm162_vm1, %v572_v4 }
 0x5c2   :  { %v688_v7 = vpack.c.b16 %v687_v6, %v687_v6 }
 0x5c3   :  { %v534_v8 = vpop.f32.mrf.mxu1 }
 0x5c4   :  { %v535_v9 = vadd.f32 %v534_v8, %v507_v63  ;;  %689 = vrot.lane.b32.xlu1 %v688_v7, %s2527_s19 }
 0x5c6   :  { %v573_v10 = vpack.c.bf16 %v535_v9, %v535_v9 }
 0x5c8   :  { %v713_v11 = vunpack.c.l.b16 %v573_v10  ;;  %2059 = vmatmul.msk.bf16.vlgmr.msrb.gmra.mxu0 %vm162_vm1, %v573_v10 }
 0x5ca   :  { %v714_v12 = vpack.c.b16 %v713_v11, %v713_v11 }
 0x5cc   :  { %715 = vrot.lane.b32.xlu0 %v714_v12, %s2527_s19 }
 0x636   :  { %v690_v18 = vpop.permute.xlu1 %689 }
 0x637   :  { %2062 = vmatmul.msk.bf16.vlgmr.msra.gmra.mxu3 %vm162_vm1, %v690_v18 }
 0x63e   :  { %v716_v19 = vpop.permute.xlu0 %715 }
 0x63f   :  { %2063 = vmatmul.msk.bf16.vlgmr.msra.gmra.mxu0 %vm162_vm1, %v716_v19 }
 0x643   :  { %v591_v20 = vpop.f32.mrf.mxu3 }
 0x644   :  { %v614_v21 = vsel %vm206_vm2, %v591_v20, -inf }
 0x645   :  { %v610_v22 = vpop.f32.mrf.mxu0  ;;  %615 = vmax.xlane.f32.xlu1 %v614_v21 }
 0x646   :  { %v617_v23 = vsel %vm206_vm2, %v610_v22, -inf }
 0x647   :  { %618 = vmax.xlane.f32.xlu2 %v617_v23 }
 0x64b   :  { %v593_v24 = vpop.f32.mrf.mxu3 }
 0x64c   :  { %v2236_v24 = vld [vmem:[%s3074_s8 + $0x8] sm:$0xff] }
 0x64d   :  { %v612_v25 = vpop.f32.mrf.mxu0  ;;  %841 = vmatpush.bf16.msrb.mxu3 %v2236_v24 }
 0x6b8   :  { %v616_v26 = vpop.xlane.xlu1 %615 }
 0x6b9   :  { %v620_v27 = vsub.f32 %v591_v20, %v616_v26 }
 0x6ba   :  { %v619_v28 = vpop.xlane.xlu2 %618  ;;  %v708_v29 = vpop.f32.mrf.mxu3 }
 0x6bb   :  { %v622_v30 = vmul.f32 1.442695, %v620_v27  ;;  %v621_v31 = vsub.f32 %v610_v22, %v619_v28  ;;  %v738_v32 = vsel %vm206_vm2, %v708_v29, -inf }
 0x6bc   :  { %v734_v33 = vpop.f32.mrf.mxu0  ;;  %739 = vmax.xlane.f32.xlu2 %v738_v32 }
 0x6bd   :  { %2321 = vpow2.f32 %v622_v30  ;;  %v624_v34 = vmul.f32 1.442695, %v621_v31  ;;  %v741_v35 = vsel %vm206_vm2, %v734_v33, -inf }
 0x6be   :  { %742 = vmax.xlane.f32.xlu0 %v741_v35 }
 0x6bf   :  { %2323 = vpow2.f32 %v624_v34 }
 0x6c2   :  { %v710_v36 = vpop.f32.mrf.mxu3 }
 0x6c3   :  { %v2322_v37 = vpop.eup %2321  ;;  %v819_v36 = vperm.slane %v2644_v5, 6 }
 0x6c4   :  { %v736_v38 = vpop.f32.mrf.mxu0  ;;  %v626_v39 = vsel %vm206_vm2, %v2322_v37, 0.0 }
 0x6c5   :  { %v2324_v40 = vpop.eup %2323 }
 0x6c6   :  { %627 = vadd.xlane.f32.xlu0 %v626_v39  ;;  %v629_v41 = vsel %vm206_vm2, %v2324_v40, 0.0 }
 0x6c7   :  { %630 = vadd.xlane.f32.xlu1 %v629_v41 }
 0x6d4   :  { %665 = vrot.lane.b32.xlu2 %v2755_v62, %s2529_s21 }
 0x6dc   :  { %762 = vrot.lane.b32.xlu2 %v2750_v57, %s2528_s20 }
 0x6e0   :  { %641 = vrot.lane.b32.xlu1 %v2750_v57, %s2529_s21 }
 0x72f   :  { %v740_v42 = vpop.xlane.xlu2 %739 }
 0x730   :  { %v744_v43 = vsub.f32 %v708_v29, %v740_v42  ;;  %v2235_v29 = vld [vmem:[%s3074_s8] sm:$0xff] }
 0x731   :  { %v743_v44 = vpop.xlane.xlu0 %742  ;;  %842 = vmatpush.bf16.msrb.mxu3 %v2235_v29  ;;  %v2242_v29 = vld [vmem:[%s3076_s10 + $0x18] sm:$0xff] }
 0x732   :  { %v746_v47 = vmul.f32 1.442695, %v744_v43  ;;  %v745_v50 = vsub.f32 %v734_v33, %v743_v44 }
 0x734   :  { %2325 = vpow2.f32 %v746_v47  ;;  %v748_v51 = vmul.f32 1.442695, %v745_v50 }
 0x736   :  { %2327 = vpow2.f32 %v748_v51 }
 0x737   :  { %v666_v52 = vpop.permute.xlu2 %665 }
 0x738   :  { %v671_v53 = vsel %vm236_vm3, %v666_v52, 0 }
 0x739   :  { %680 = vmatpush.bf16.msrb.mxu2 %v671_v53  ;;  %v628_v61 = vpop.xlane.xlu0 %627 }
 0x73a   :  { %v2326_v54 = vpop.eup %2325  ;;  %v631_v55 = vpop.xlane.xlu1 %630 }
 0x73b   :  { %2329 = vrcp.f32 %v631_v55  ;;  %v750_v56 = vsel %vm206_vm2, %v2326_v54, 0.0 }
 0x73c   :  { %751 = vadd.xlane.f32.xlu0 %v750_v56  ;;  %v2328_v58 = vpop.eup %2327  ;;  %2331 = vrcp.f32 %v628_v61 }
 0x73d   :  { %v753_v59 = vsel %vm206_vm2, %v2328_v58, 0.0 }
 0x73f   :  { %v763_v1 = vpop.permute.xlu2 %762 }
 0x740   :  { %v768_v7 = vsel %vm236_vm3, %v763_v1, 0 }
 0x741   :  { %v2330_v57 = vpop.eup %2329 }
 0x742   :  { %v635_v2 = vmul.f32 %v2330_v57, %v2324_v40  ;;  %v2332_v63 = vpop.eup %2331  ;;  %v2238_v57 = vld [vmem:[#allocation8 + $0x8] sm:$0xff] }
 0x743   :  { %v634_v0 = vmul.f32 %v2332_v63, %v2322_v37  ;;  %930 = vmatpush.bf16.msrb.mxu0 %v2238_v57 }
 0x744   :  { %v637_v60 = vpack.c.bf16 %v635_v2, %v635_v2  ;;  %754 = vadd.xlane.f32.xlu0 %v753_v59 }
 0x745   :  { %v636_v8 = vpack.c.bf16 %v634_v0, %v634_v0 }
 0x746   :  { %2061 = vmatmul.msk.bf16.vlgmr.msrb.gmra.mxu2 %vm206_vm2, %v637_v60  ;;  %v2237_v60 = vld [vmem:[#allocation8] sm:$0xff] }
 0x747   :  { %931 = vmatpush.bf16.msrb.mxu0 %v2237_v60 }
 0x752   :  { %v642_v4 = vpop.permute.xlu1 %641 }
 0x753   :  { %v647_v6 = vsel %vm236_vm3, %v642_v4, 0 }
 0x754   :  { %656 = vmatpush.bf16.msrb.mxu1 %v647_v6 }
 0x757   :  { %2060 = vmatmul.msk.bf16.vlgmr.msrb.gmra.mxu1 %vm206_vm2, %v636_v8 }
 0x758   :  { %777 = vmatpush.bf16.msra.mxu1 %v768_v7  ;;  %783 = vrot.lane.b32.xlu0 %v2755_v62, %s2528_s20 }
 0x75c   :  { %982 = vmatpush.bf16.msrb.mxu1 %v2242_v29 }
 0x7af   :  { %v752_v9 = vpop.xlane.xlu0 %751 }
 0x7b0   :  { %2333 = vrcp.f32 %v752_v9 }
 0x7b6   :  { %v2334_v10 = vpop.eup %2333 }
 0x7b7   :  { %v758_v11 = vmul.f32 %v2334_v10, %v2326_v54  ;;  %v755_v13 = vpop.xlane.xlu0 %754 }
 0x7b8   :  { %2335 = vrcp.f32 %v755_v13 }
 0x7b9   :  { %v760_v12 = vpack.c.bf16 %v758_v11, %v758_v11 }
 0x7bb   :  { %2064 = vmatmul.msk.bf16.vlgmr.msra.gmra.mxu1 %vm206_vm2, %v760_v12 }
 0x7be   :  { %v2336_v14 = vpop.eup %2335 }
 0x7bf   :  { %v759_v16 = vmul.f32 %v2336_v14, %v2328_v58 }
 0x7c1   :  { %v761_v20 = vpack.c.bf16 %v759_v16, %v759_v16  ;;  %v895_v16 = vperm.slane %v2644_v5, 7 }
 0x7c9   :  { %v682_v17 = vpop.f32.mrf.mxu2 }
 0x7ca   :  { %v784_v18 = vpop.permute.xlu0 %783 }
 0x7cb   :  { %v789_v19 = vsel %vm236_vm3, %v784_v18, 0  ;;  %v2817_v18 = vld [vmem:[%s3077_s11 + $0x8] sm:$0x1f] }
 0x7cc   :  { %798 = vmatpush.bf16.msra.mxu2 %v789_v19 }
 0x7cf   :  { %2065 = vmatmul.msk.bf16.vlgmr.msra.gmra.mxu2 %vm206_vm2, %v761_v20 }
 0x7d1   :  { %v684_v62 = vpop.f32.mrf.mxu2 }
 0x7d2   :  { %v898_v62 = vperm.slane %v2817_v18, 0 }
 0x7d4   :  { %v658_v21 = vpop.f32.mrf.mxu1 }
 0x7dc   :  { %v660_v22 = vpop.f32.mrf.mxu1 }
 0x838   :  { %v779_v23 = vpop.f32.mrf.mxu1 }
 0x840   :  { %v781_v25 = vpop.f32.mrf.mxu1 }
 0x852   :  { %v800_v26 = vpop.f32.mrf.mxu2 }
 0x853   :  { %v2284_v27 = vpack.i.bf16 %v800_v26, %v779_v23 }
 0x855   :  { %2285 = vrot.lane.b32.xlu1 %v2284_v27, %s2531_s23 }
 0x85a   :  { %v802_v28 = vpop.f32.mrf.mxu2 }
 0x8c7   :  { %v2286_v30 = vpop.permute.xlu1 %2285 }
 0x8c8   :  { %v2288_v31 = vunpack.i.h.bf16 %v2286_v30  ;;  %v2287_v32 = vunpack.i.l.bf16 %v2286_v30  ;;  %v2241_v30 = vld [vmem:[%s3076_s10 + $0x10] sm:$0xff] }
 0x8c9   :  { %983 = vmatpush.bf16.msrb.mxu1 %v2241_v30 }
 0x8ca   :  { %v813_v33 = vsel %vm162_vm1, %v682_v17, %v2288_v31  ;;  %v812_v34 = vsel %vm162_vm1, %v658_v21, %v2287_v32  ;;  %v2240_v31 = vld [vmem:[%s3076_s10 + $0x8] sm:$0xff]  ;;  %v2239_v32 = vld [vmem:[%s3076_s10] sm:$0xff] }
 0x8cb   :  { %v818_v35 = vpack.c.bf16 %v813_v33, %v812_v34  ;;  %v908_v34 = vperm.slane %v2817_v18, 1 }
 0x8cd   :  { %2074 = vmatmul.msk.bf16.vlgmr.msrb.gmra.mxu3 %vm137_vm0, %v818_v35  ;;  %984 = vmatpush.bf16.msrb.mxu1 %v2240_v31 }
 0x8d1   :  { %985 = vmatpush.bf16.msrb.mxu1 %v2239_v32 }
 0x950   :  { %v844_v37 = vpop.f32.mrf.mxu3 }
 0x951   :  { %v845_v38 = vadd.f32 %v844_v37, %v819_v36 }
 0x953   :  { %v849_v39 = vadd.f32 %v845_v38, %v2740_v48 }
 0x955   :  { %v851_v40 = vsel %vm137_vm0, %v849_v39, 0.0 }
 0x956   :  { %852 = vadd.xlane.f32.xlu2 %v851_v40 }
 0x958   :  { %v846_v41 = vpop.f32.mrf.mxu3 }
 0x959   :  { %v847_v42 = vadd.f32 %v846_v41, %v819_v36  ;;  %v949_v41 = vperm.slane %v2817_v18, 2 }
 0x95b   :  { %v850_v43 = vadd.f32 %v847_v42, %v2743_v49 }
 0x95d   :  { %v854_v44 = vsel %vm137_vm0, %v850_v43, 0.0 }
 0x95e   :  { %855 = vadd.xlane.f32.xlu1 %v854_v44 }
 0x9c9   :  { %v853_v47 = vpop.xlane.xlu2 %852 }
 0x9ca   :  { %v857_v50 = vmul.f32 %v853_v47, %v2706_v3 }
 0x9cc   :  { %v859_v51 = vsub.f32 %v849_v39, %v857_v50 }
 0x9ce   :  { %v861_v52 = vmul.f32 %v859_v51, %v859_v51 }
 0x9d0   :  { %v863_v53 = vsel %vm137_vm0, %v861_v52, 0.0 }
 0x9d1   :  { %v856_v54 = vpop.xlane.xlu1 %855  ;;  %864 = vadd.xlane.f32.xlu0 %v863_v53 }
 0x9d2   :  { %v858_v48 = vmul.f32 %v856_v54, %v2706_v3 }
 0x9d4   :  { %v860_v55 = vsub.f32 %v850_v43, %v858_v48 }
 0x9d6   :  { %v862_v56 = vmul.f32 %v860_v55, %v860_v55 }
 0x9d8   :  { %v866_v58 = vsel %vm137_vm0, %v862_v56, 0.0 }
 0x9d9   :  { %867 = vadd.xlane.f32.xlu2 %v866_v58 }
 0xa44   :  { %v865_v49 = vpop.xlane.xlu0 %864 }
 0xa45   :  { %v869_v2 = vmul.f32 %v865_v49, %v2706_v3 }
 0xa47   :  { %v871_v59 = vadd.f32 1e-05, %v869_v2 }
 0xa49   :  { %2337 = vrsqrt.f32 %v871_v59  ;;  %vm879_vm12 = vweird.f32 %v871_v59 }
 0xa4c   :  { %v868_v61 = vpop.xlane.xlu2 %867 }
 0xa4d   :  { %v870_v63 = vmul.f32 %v868_v61, %v2706_v3 }
 0xa4f   :  { %v2338_v0 = vpop.eup %2337  ;;  %v872_v1 = vadd.f32 1e-05, %v870_v63  ;;  %v2244_v63 = vld [vmem:[%s3070_s4 + $0x18] sm:$0xff] }
 0xa50   :  { %v874_v4 = vmul.f32 %v2338_v0, %v871_v59  ;;  %vm880_vm11 = vweird.f32 %v2338_v0  ;;  %1077 = vmatpush.bf16.msrb.mxu2 %v2244_v63 }
 0xa51   :  { %2339 = vrsqrt.f32 %v872_v1  ;;  %vm881_vm13 = vmor %vm879_vm12, %vm880_vm11  ;;  %vm889_vm15 = vweird.f32 %v872_v1 }
 0xa52   :  { %v875_v6 = vmul.f32 %v2338_v0, %v874_v4  ;;  %v2243_v4 = vld [vmem:[%s3070_s4 + $0x10] sm:$0xff] }
 0xa54   :  { %v876_v7 = vmul.f32 0.5, %v875_v6  ;;  %1078 = vmatpush.bf16.msrb.mxu2 %v2243_v4 }
 0xa56   :  { %v877_v8 = vsub.f32 1.5, %v876_v7 }
 0xa57   :  { %v2340_v9 = vpop.eup %2339 }
 0xa58   :  { %v878_v10 = vmul.f32 %v2338_v0, %v877_v8  ;;  %v884_v11 = vmul.f32 %v2340_v9, %v872_v1  ;;  %vm890_vm14 = vweird.f32 %v2340_v9 }
 0xa59   :  { %vm891_vm4 = vmor %vm889_vm15, %vm890_vm14 }
 0xa5a   :  { %v882_v12 = vsel %vm881_vm13, %v2338_v0, %v878_v10  ;;  %v885_v13 = vmul.f32 %v2340_v9, %v884_v11 }
 0xa5b   :  { %v893_v17 = vmul.f32 %v882_v12, %v859_v51 }
 0xa5c   :  { %v886_v14 = vmul.f32 0.5, %v885_v13 }
 0xa5d   :  { %v896_v21 = vmul.f32 %v895_v16, %v893_v17 }
 0xa5e   :  { %v887_v19 = vsub.f32 1.5, %v886_v14 }
 0xa5f   :  { %v899_v24 = vadd.f32 %v898_v62, %v896_v21  ;;  %v1038_v21 = vperm.slane %v2817_v18, 3 }
 0xa60   :  { %v888_v20 = vmul.f32 %v2340_v9, %v887_v19 }
 0xa61   :  { %v901_v5 = vmul.f32 %v899_v24, %v2735_v45 }
 0xa62   :  { %v892_v22 = vsel %vm891_vm4, %v2340_v9, %v888_v20 }
 0xa63   :  { %v894_v23 = vmul.f32 %v892_v22, %v860_v55 }
 0xa65   :  { %v897_v25 = vmul.f32 %v895_v16, %v894_v23 }
 0xa67   :  { %v900_v26 = vadd.f32 %v898_v62, %v897_v25  ;;  %v1041_v25 = vperm.slane %v2817_v18, 4  ;;  %v2866_v18 = vld [vmem:[%s3077_s11 + $0x10] sm:$0xff] }
 0xa69   :  { %v902_v27 = vmul.f32 %v900_v26, %v2737_v46 }
 0xa6b   :  { %v907_v28 = vpack.c.bf16 %v902_v27, %v901_v5 }
 0xa6d   :  { %2083 = vmatmul.msk.bf16.vlgmr.msrb.gmra.mxu0 %vm137_vm0, %v907_v28 }
 0xaea   :  { %v933_v33 = vpop.f32.mrf.mxu0 }
 0xaeb   :  { %v934_v35 = vadd.f32 %v933_v33, %v908_v34 }
 0xaed   :  { %v938_v38 = vmax.f32 %v934_v35, 0.0 }
 0xaf2   :  { %v935_v36 = vpop.f32.mrf.mxu0 }
 0xaf3   :  { %v936_v37 = vadd.f32 %v935_v36, %v908_v34  ;;  %v1055_v34 = vperm.slane %v2866_v18, 0 }
 0xaf5   :  { %v939_v39 = vmax.f32 %v936_v37, 0.0 }
 0xaf7   :  { %v948_v40 = vpack.c.bf16 %v939_v39, %v938_v38 }
 0xaf9   :  { %2100 = vmatmul.msk.bf16.vlgmr.msrb.gmra.mxu1 %vm974_vm5, %v948_v40 }
 0xb76   :  { %v987_v42 = vpop.f32.mrf.mxu1 }
 0xb77   :  { %v988_v43 = vadd.f32 %v987_v42, %v949_v41 }
 0xb79   :  { %v992_v44 = vadd.f32 %v988_v43, %v901_v5 }
 0xb7b   :  { %v994_v47 = vsel %vm137_vm0, %v992_v44, 0.0 }
 0xb7c   :  { %995 = vadd.xlane.f32.xlu1 %v994_v47 }
 0xb7e   :  { %v989_v50 = vpop.f32.mrf.mxu1 }
 0xb7f   :  { %v990_v51 = vadd.f32 %v989_v50, %v949_v41 }
 0xb81   :  { %v993_v52 = vadd.f32 %v990_v51, %v902_v27 }
 0xb83   :  { %v997_v53 = vsel %vm137_vm0, %v993_v52, 0.0 }
 0xb84   :  { %998 = vadd.xlane.f32.xlu2 %v997_v53 }
 0xbef   :  { %v996_v54 = vpop.xlane.xlu1 %995 }
 0xbf0   :  { %v1000_v48 = vmul.f32 %v996_v54, %v2706_v3 }
 0xbf2   :  { %v1002_v55 = vsub.f32 %v992_v44, %v1000_v48 }
 0xbf4   :  { %v1004_v56 = vmul.f32 %v1002_v55, %v1002_v55 }
 0xbf6   :  { %v1006_v58 = vsel %vm137_vm0, %v1004_v56, 0.0 }
 0xbf7   :  { %v999_v49 = vpop.xlane.xlu2 %998  ;;  %1007 = vadd.xlane.f32.xlu0 %v1006_v58 }
 0xbf8   :  { %v1001_v57 = vmul.f32 %v999_v49, %v2706_v3 }
 0xbfa   :  { %v1003_v2 = vsub.f32 %v993_v52, %v1001_v57  ;;  %v2389_v57 = vld [vmem:[#allocation7] sm:$0xff] }
 0xbfc   :  { %v1005_v59 = vmul.f32 %v1003_v2, %v1003_v2 }
 0xbfe   :  { %v1009_v60 = vsel %vm137_vm0, %v1005_v59, 0.0 }
 0xbff   :  { %1010 = vadd.xlane.f32.xlu1 %v1009_v60 }
 0xc6a   :  { %v1008_v61 = vpop.xlane.xlu0 %1007 }
 0xc6b   :  { %v1012_v0 = vmul.f32 %v1008_v61, %v2706_v3 }
 0xc6d   :  { %v1014_v1 = vadd.f32 1e-05, %v1012_v0 }
 0xc6f   :  { %2341 = vrsqrt.f32 %v1014_v1  ;;  %vm1022_vm7 = vweird.f32 %v1014_v1 }
 0xc72   :  { %v1011_v6 = vpop.xlane.xlu1 %1010 }
 0xc73   :  { %v1013_v7 = vmul.f32 %v1011_v6, %v2706_v3 }
 0xc75   :  { %v2342_v8 = vpop.eup %2341  ;;  %v1015_v9 = vadd.f32 1e-05, %v1013_v7 }
 0xc76   :  { %v1017_v10 = vmul.f32 %v2342_v8, %v1014_v1  ;;  %vm1023_vm6 = vweird.f32 %v2342_v8  ;;  %v2390_v1 = vld [vmem:[#allocation7 + $0x8] sm:$0xff] }
 0xc77   :  { %2343 = vrsqrt.f32 %v1015_v9  ;;  %vm1024_vm8 = vmor %vm1022_vm7, %vm1023_vm6  ;;  %vm1032_vm10 = vweird.f32 %v1015_v9 }
 0xc78   :  { %v1018_v11 = vmul.f32 %v2342_v8, %v1017_v10 }
 0xc7a   :  { %v1019_v12 = vmul.f32 0.5, %v1018_v11 }
 0xc7c   :  { %v1020_v13 = vsub.f32 1.5, %v1019_v12 }
 0xc7d   :  { %v2344_v14 = vpop.eup %2343 }
 0xc7e   :  { %v1021_v16 = vmul.f32 %v2342_v8, %v1020_v13  ;;  %v1027_v17 = vmul.f32 %v2344_v14, %v1015_v9  ;;  %vm1033_vm9 = vweird.f32 %v2344_v14 }
 0xc7f   :  { %vm1034_vm11 = vmor %vm1032_vm10, %vm1033_vm9 }
 0xc80   :  { %v1025_v19 = vsel %vm1024_vm8, %v2342_v8, %v1021_v16  ;;  %v1028_v20 = vmul.f32 %v2344_v14, %v1027_v17 }
 0xc81   :  { %v1036_v22 = vmul.f32 %v1025_v19, %v1002_v55 }
 0xc82   :  { %v1029_v62 = vmul.f32 0.5, %v1028_v20 }
 0xc83   :  { %v1039_v26 = vmul.f32 %v1038_v21, %v1036_v22 }
 0xc84   :  { %v1030_v23 = vsub.f32 1.5, %v1029_v62 }
 0xc85   :  { %v1042_v28 = vadd.f32 %v1041_v25, %v1039_v26 }
 0xc86   :  { %v1031_v24 = vmul.f32 %v2344_v14, %v1030_v23 }
 0xc87   :  { %v2855_v31 = vmul.f32 %v1042_v28, %v2735_v45 }
 0xc88   :  { %v1035_v5 = vsel %vm1034_vm11, %v2344_v14, %v1031_v24 }
 0xc89   :  { %v1037_v27 = vmul.f32 %v1035_v5, %v1003_v2 }
 0xc8b   :  { %v1040_v29 = vmul.f32 %v1038_v21, %v1037_v27 }
 0xc8d   :  { %v1043_v30 = vadd.f32 %v1041_v25, %v1040_v29 }
 0xc8f   :  { %v2858_v32 = vmul.f32 %v1043_v30, %v2737_v46 }
 0xc91   :  { %v1054_v33 = vpack.c.bf16 %v2858_v32, %v2855_v31 }
 0xc93   :  { %2115 = vmatmul.msk.bf16.vlgmr.msrb.gmra.mxu2 %vm137_vm0, %v1054_v33 }
 0xd16   :  { %v1080_v35 = vpop.f32.mrf.mxu2 }
 0xd17   :  { %v1081_v36 = vadd.f32 %v1080_v35, %v1055_v34 }
 0xd19   :  { %v1085_v37 = vpack.c.bf16 %v1081_v36, %v1081_v36 }
 0xd1b   :  { %v1088_v38 = vunpack.c.l.b16 %v1085_v37 }
 0xd1d   :  { %v2869_v39 = vpack.c.b16 %v1088_v38, %v1088_v38 }
 0xd1e   :  { %v1082_v40 = vpop.f32.mrf.mxu2 }
 0xd1f   :  { %v1083_v41 = vadd.f32 %v1082_v40, %v1055_v34  ;;  %1203 = vrot.lane.b32.xlu1 %v2869_v39, %s2528_s20  ;;  %1090 = vrot.lane.b32.xlu2 %v2869_v39, %s2529_s21 }
 0xd21   :  { %v1086_v42 = vpack.c.bf16 %v1083_v41, %v1083_v41 }
 0xd23   :  { %v1112_v43 = vunpack.c.l.b16 %v1086_v42 }
 0xd25   :  { %v1113_v44 = vpack.c.b16 %v1112_v43, %v1112_v43 }
 0xd27   :  { %1114 = vrot.lane.b32.xlu0 %v1113_v44, %s2529_s21  ;;  %1201 = vrot.lane.b32.xlu2 %v2869_v39, %s2527_s19 }
 0xd2f   :  { %1226 = vrot.lane.b32.xlu0 %v1113_v44, %s2528_s20 }
 0xd37   :  { %1224 = vrot.lane.b32.xlu0 %v1113_v44, %s2527_s19 }
 0xd79   :  { %v1091_v47 = vpop.permute.xlu2 %1090 }
 0xd7a   :  { %v1096_v50 = vsel %vm162_vm1, %v1091_v47, 0 }
 0xd7b   :  { %1105 = vmatpush.bf16.xpose.msra.mxu3 %v1096_v50 }
 0xd81   :  { %v1202_v53 = vpop.permute.xlu2 %1201 }
 0xd82   :  { %2116 = vmatmul.msk.bf16.vlgmr.msra.gmra.mxu3 %vm162_vm1, %v1085_v37 }
 0xd91   :  { %v1204_v51 = vpop.permute.xlu1 %1203 }
 0xd92   :  { %v1209_v52 = vsel %vm162_vm1, %v1204_v51, 0 }
 0xd93   :  { %1218 = vmatpush.bf16.xpose.msrb.mxu3 %v1209_v52 }
 0xd99   :  { %v1115_v54 = vpop.permute.xlu0 %1114 }
 0xd9a   :  { %v1120_v48 = vsel %vm162_vm1, %v1115_v54, 0  ;;  %2120 = vmatmul.msk.bf16.vlgmr.msrb.gmra.mxu3 %vm162_vm1, %v1202_v53 }
 0xd9b   :  { %1129 = vmatpush.bf16.xpose.msra.mxu0 %v1120_v48 }
 0xda1   :  { %v1227_v55 = vpop.permute.xlu0 %1226 }
 0xda2   :  { %v1232_v56 = vsel %vm162_vm1, %v1227_v55, 0  ;;  %2117 = vmatmul.msk.bf16.vlgmr.msra.gmra.mxu0 %vm162_vm1, %v1086_v42 }
 0xda3   :  { %1241 = vmatpush.bf16.xpose.msrb.mxu0 %v1232_v56 }
 0xda9   :  { %v1225_v58 = vpop.permute.xlu0 %1224 }
 0xdb2   :  { %2121 = vmatmul.msk.bf16.vlgmr.msrb.gmra.mxu0 %vm162_vm1, %v1225_v58 }
 0xe05   :  { %v1107_v49 = vpop.f32.mrf.mxu3 }
 0xe06   :  { %v1108_v2 = vadd.f32 %v2389_v57, %v1107_v49 }
 0xe08   :  { %v1135_v59 = vsel %vm206_vm2, %v1108_v2, -inf }
 0xe09   :  { %1136 = vmax.xlane.f32.xlu2 %v1135_v59 }
 0xe0d   :  { %v1109_v60 = vpop.f32.mrf.mxu3 }
 0xe1d   :  { %v1220_v61 = vpop.f32.mrf.mxu3 }
 0xe1e   :  { %v1221_v63 = vadd.f32 %v2389_v57, %v1220_v61 }
 0xe1f   :  { %v1131_v0 = vpop.f32.mrf.mxu0 }
 0xe20   :  { %v1132_v4 = vadd.f32 %v2390_v1, %v1131_v0  ;;  %v1247_v6 = vsel %vm206_vm2, %v1221_v63, -inf }
 0xe21   :  { %1248 = vmax.xlane.f32.xlu2 %v1247_v6 }
 0xe22   :  { %v1138_v7 = vsel %vm206_vm2, %v1132_v4, -inf }
 0xe23   :  { %1139 = vmax.xlane.f32.xlu1 %v1138_v7 }
 0xe25   :  { %v1222_v8 = vpop.f32.mrf.mxu3 }
 0xe27   :  { %v1133_v9 = vpop.f32.mrf.mxu0 }
 0xe2f   :  { %v1243_v10 = vpop.f32.mrf.mxu0 }
 0xe30   :  { %v1244_v11 = vadd.f32 %v2390_v1, %v1243_v10 }
 0xe32   :  { %v1250_v12 = vsel %vm206_vm2, %v1244_v11, -inf }
 0xe33   :  { %1251 = vmax.xlane.f32.xlu0 %v1250_v12 }
 0xe37   :  { %v1245_v13 = vpop.f32.mrf.mxu0 }
 0xe47   :  { %1180 = vrot.lane.b32.xlu0 %v1113_v44, %s2525_s27 }
 0xe4f   :  { %1292 = vrot.lane.b32.xlu0 %v1113_v44, %s2530_s1 }
 0xe7c   :  { %v1137_v14 = vpop.xlane.xlu2 %1136 }
 0xe7d   :  { %v1141_v16 = vsub.f32 %v1108_v2, %v1137_v14 }
 0xe7f   :  { %v1143_v17 = vmul.f32 1.442695, %v1141_v16 }
 0xe81   :  { %2345 = vpow2.f32 %v1143_v17 }
 0xe87   :  { %v2346_v19 = vpop.eup %2345 }
 0xe88   :  { %v1147_v20 = vsel %vm206_vm2, %v2346_v19, 0.0 }
 0xe89   :  { %1148 = vadd.xlane.f32.xlu2 %v1147_v20  ;;  %v1329_v20 = vperm.slane %v2866_v18, 1 }
 0xe94   :  { %v1249_v62 = vpop.xlane.xlu2 %1248 }
 0xe95   :  { %v1253_v21 = vsub.f32 %v1221_v63, %v1249_v62  ;;  %v2246_v63 = vld [vmem:[%s3071_s5 + $0x18] sm:$0xff] }
 0xe96   :  { %v1140_v22 = vpop.xlane.xlu1 %1139  ;;  %1351 = vmatpush.bf16.msra.mxu3 %v2246_v63  ;;  %v1408_v63 = vperm.slane %v2866_v18, 3 }
 0xe97   :  { %v1255_v23 = vmul.f32 1.442695, %v1253_v21  ;;  %v1142_v24 = vsub.f32 %v1132_v4, %v1140_v22 }
 0xe99   :  { %2347 = vpow2.f32 %v1255_v23  ;;  %v1145_v25 = vmul.f32 1.442695, %v1142_v24 }
 0xe9b   :  { %2349 = vpow2.f32 %v1145_v25 }
 0xe9f   :  { %v2348_v26 = vpop.eup %2347 }
 0xea0   :  { %v1259_v5 = vsel %vm206_vm2, %v2348_v26, 0.0 }
 0xea1   :  { %v2350_v27 = vpop.eup %2349  ;;  %1260 = vadd.xlane.f32.xlu2 %v1259_v5 }
 0xea2   :  { %v1150_v28 = vsel %vm206_vm2, %v2350_v27, 0.0 }
 0xea3   :  { %1151 = vadd.xlane.f32.xlu1 %v1150_v28 }
 0xea6   :  { %v1252_v29 = vpop.xlane.xlu0 %1251 }
 0xea7   :  { %v1254_v30 = vsub.f32 %v1244_v11, %v1252_v29  ;;  %v2245_v11 = vld [vmem:[%s3071_s5 + $0x10] sm:$0xff] }
 0xea8   :  { %1352 = vmatpush.bf16.msra.mxu3 %v2245_v11 }
 0xea9   :  { %v1257_v33 = vmul.f32 1.442695, %v1254_v30 }
 0xeab   :  { %2351 = vpow2.f32 %v1257_v33 }
 0xeb1   :  { %v2352_v34 = vpop.eup %2351 }
 0xeb2   :  { %v1262_v35 = vsel %vm206_vm2, %v2352_v34, 0.0 }
 0xeb3   :  { %1263 = vadd.xlane.f32.xlu2 %v1262_v35 }
 0xeb9   :  { %v1181_v36 = vpop.permute.xlu0 %1180 }
 0xeba   :  { %v1186_v37 = vsel %vm236_vm3, %v1181_v36, 0 }
 0xebb   :  { %1195 = vmatpush.bf16.msra.mxu2 %v1186_v37 }
 0xebc   :  { %1159 = vrot.lane.b32.xlu1 %v2869_v39, %s2525_s27 }
 0xec1   :  { %v1293_v38 = vpop.permute.xlu0 %1292 }
 0xec2   :  { %v1298_v40 = vsel %vm236_vm3, %v1293_v38, 0  ;;  %v2249_v38 = vld [vmem:[%s3073_s7 + $0x10] sm:$0xff] }
 0xec3   :  { %1307 = vmatpush.bf16.msrb.mxu2 %v1298_v40 }
 0xecb   :  { %1271 = vrot.lane.b32.xlu2 %v2869_v39, %s2530_s1 }
 0xefc   :  { %v1149_v41 = vpop.xlane.xlu2 %1148 }
 0xf14   :  { %v1261_v44 = vpop.xlane.xlu2 %1260 }
 0xf16   :  { %v1152_v42 = vpop.xlane.xlu1 %1151 }
 0xf17   :  { %2353 = vrcp.f32 %v1152_v42 }
 0xf18   :  { %2355 = vrcp.f32 %v1149_v41  ;;  %v2248_v41 = vld [vmem:[%s3072_s6 + $0x18] sm:$0xff] }
 0xf19   :  { %1441 = vmatpush.bf16.msra.mxu0 %v2248_v41 }
 0xf1d   :  { %v2354_v43 = vpop.eup %2353 }
 0xf1e   :  { %v1156_v47 = vmul.f32 %v2354_v43, %v2350_v27  ;;  %v2356_v52 = vpop.eup %2355 }
 0xf1f   :  { %v1155_v54 = vmul.f32 %v2356_v52, %v2346_v19 }
 0xf20   :  { %v1158_v50 = vpack.c.bf16 %v1156_v47, %v1156_v47 }
 0xf21   :  { %v1157_v57 = vpack.c.bf16 %v1155_v54, %v1155_v54 }
 0xf22   :  { %2119 = vmatmul.msk.bf16.vlgmr.msra.gmra.mxu2 %vm206_vm2, %v1158_v50 }
 0xf26   :  { %v1264_v51 = vpop.xlane.xlu2 %1263 }
 0xf27   :  { %2357 = vrcp.f32 %v1264_v51 }
 0xf28   :  { %2359 = vrcp.f32 %v1261_v44  ;;  %v2247_v44 = vld [vmem:[%s3072_s6 + $0x10] sm:$0xff] }
 0xf29   :  { %1442 = vmatpush.bf16.msra.mxu0 %v2247_v44 }
 0xf2d   :  { %v2358_v53 = vpop.eup %2357 }
 0xf2e   :  { %v1268_v48 = vmul.f32 %v2358_v53, %v2352_v34  ;;  %v1160_v55 = vpop.permute.xlu1 %1159  ;;  %v1272_v56 = vpop.permute.xlu2 %1271 }
 0xf2f   :  { %v1165_v39 = vsel %vm236_vm3, %v1160_v55, 0  ;;  %v1277_v58 = vsel %vm236_vm3, %v1272_v56, 0  ;;  %v2360_v2 = vpop.eup %2359 }
 0xf30   :  { %v1270_v49 = vpack.c.bf16 %v1268_v48, %v1268_v48  ;;  %1174 = vmatpush.bf16.msra.mxu1 %v1165_v39  ;;  %v1267_v59 = vmul.f32 %v2360_v2, %v2348_v26  ;;  %v1405_v2 = vperm.slane %v2866_v18, 2 }
 0xf32   :  { %2123 = vmatmul.msk.bf16.vlgmr.msrb.gmra.mxu2 %vm206_vm2, %v1270_v49  ;;  %v1269_v60 = vpack.c.bf16 %v1267_v59, %v1267_v59 }
 0xf33   :  { %2118 = vmatmul.msk.bf16.vlgmr.msra.gmra.mxu1 %vm206_vm2, %v1157_v57 }
 0xf34   :  { %1286 = vmatpush.bf16.msrb.mxu1 %v1277_v58 }
 0xf43   :  { %2122 = vmatmul.msk.bf16.vlgmr.msrb.gmra.mxu1 %vm206_vm2, %v1269_v60 }
 0xfa5   :  { %v1197_v61 = vpop.f32.mrf.mxu2 }
 0xfad   :  { %v1199_v0 = vpop.f32.mrf.mxu2 }
 0xfb0   :  { %v1176_v1 = vpop.f32.mrf.mxu1 }
 0xfb5   :  { %v1309_v4 = vpop.f32.mrf.mxu2 }
 0xfb8   :  { %v1178_v6 = vpop.f32.mrf.mxu1 }
 0xfbd   :  { %v1311_v7 = vpop.f32.mrf.mxu2 }
 0xfc0   :  { %v1288_v8 = vpop.f32.mrf.mxu1 }
 0xfc1   :  { %v2289_v9 = vpack.i.bf16 %v1309_v4, %v1288_v8 }
 0xfc3   :  { %2290 = vrot.lane.b32.xlu1 %v2289_v9, %s2531_s23 }
 0xfc8   :  { %v1290_v10 = vpop.f32.mrf.mxu1 }
0x1035   :  { %v2291_v12 = vpop.permute.xlu1 %2290 }
0x1036   :  { %v2293_v13 = vunpack.i.h.bf16 %v2291_v12  ;;  %v2292_v14 = vunpack.i.l.bf16 %v2291_v12  ;;  %v1454_v12 = vperm.slane %v2866_v18, 5 }
0x1038   :  { %v1322_v16 = vsel %vm162_vm1, %v1197_v61, %v2293_v13  ;;  %v1321_v17 = vsel %vm162_vm1, %v1176_v1, %v2292_v14 }
0x1039   :  { %v1328_v19 = vpack.c.bf16 %v1322_v16, %v1321_v17 }
0x103b   :  { %2136 = vmatmul.msk.bf16.vlgmr.msra.gmra.mxu3 %vm137_vm0, %v1328_v19 }
0x10be   :  { %v1354_v62 = vpop.f32.mrf.mxu3 }
0x10bf   :  { %v1355_v21 = vadd.f32 %v1354_v62, %v1329_v20 }
0x10c1   :  { %v1359_v22 = vadd.f32 %v1355_v21, %v2855_v31 }
0x10c3   :  { %v1361_v23 = vsel %vm137_vm0, %v1359_v22, 0.0 }
0x10c4   :  { %1362 = vadd.xlane.f32.xlu0 %v1361_v23 }
0x10c6   :  { %v1356_v24 = vpop.f32.mrf.mxu3 }
0x10c7   :  { %v1357_v25 = vadd.f32 %v1356_v24, %v1329_v20 }
0x10c9   :  { %v1360_v26 = vadd.f32 %v1357_v25, %v2858_v32  ;;  %v2250_v32 = vld [vmem:[%s3073_s7 + $0x18] sm:$0xff] }
0x10ca   :  { %1473 = vmatpush.bf16.msra.mxu1 %v2250_v32 }
0x10cb   :  { %v1364_v5 = vsel %vm137_vm0, %v1360_v26, 0.0 }
0x10cc   :  { %1365 = vadd.xlane.f32.xlu1 %v1364_v5 }
0x10ce   :  { %1474 = vmatpush.bf16.msra.mxu1 %v2249_v38 }
0x10d1   :  { %2162 = vmatmul.msk.bf16.vlgmr.msra.gmra.mxu1 %vm137_vm0, %v2721_v15 }
0x1137   :  { %v1363_v27 = vpop.xlane.xlu0 %1362 }
0x1138   :  { %v1367_v28 = vmul.f32 %v1363_v27, %v2706_v3 }
0x113a   :  { %v1369_v29 = vsub.f32 %v1359_v22, %v1367_v28 }
0x113c   :  { %v1371_v30 = vmul.f32 %v1369_v29, %v1369_v29 }
0x113e   :  { %v1373_v33 = vsel %vm137_vm0, %v1371_v30, 0.0 }
0x113f   :  { %v1366_v34 = vpop.xlane.xlu1 %1365  ;;  %1374 = vadd.xlane.f32.xlu2 %v1373_v33 }
0x1140   :  { %v1368_v31 = vmul.f32 %v1366_v34, %v2706_v3 }
0x1142   :  { %v1370_v35 = vsub.f32 %v1360_v26, %v1368_v31  ;;  %v1419_v26 = vperm.slane %v2866_v18, 4 }
0x1144   :  { %v1372_v36 = vmul.f32 %v1370_v35, %v1370_v35 }
0x1146   :  { %v1376_v37 = vsel %vm137_vm0, %v1372_v36, 0.0 }
0x1147   :  { %1377 = vadd.xlane.f32.xlu0 %v1376_v37 }
0x114e   :  { %v1476_v13 = vpop.f32.mrf.mxu1 }
0x114f   :  { %v1477_v14 = vadd.f32 %v1476_v13, %v1454_v12 }
0x1151   :  { %v1483_v16 = vpack.c.bf16 %v1477_v14, %v1477_v14 }
0x1153   :  { %v1489_v17 = vsel %vm162_vm1, %v1483_v16, 0  ;;  %v1548_v19 = vunpack.c.l.b16 %v1483_v16 }
0x1154   :  { %1498 = vmatpush.bf16.xpose.msra.mxu2 %v1489_v17 }
0x1155   :  { %v2958_v20 = vpack.c.b16 %v1548_v19, %v1548_v19 }
0x1156   :  { %v1478_v62 = vpop.f32.mrf.mxu1 }
0x1157   :  { %1600 = vrot.lane.b32.xlu1 %v2958_v20, %s2527_s19  ;;  %v1479_v21 = vadd.f32 %v1478_v62, %v1454_v12 }
0x1159   :  { %v1484_v22 = vpack.c.bf16 %v1479_v21, %v1479_v21 }
0x115b   :  { %v1508_v23 = vsel %vm162_vm1, %v1484_v22, 0  ;;  %v1572_v24 = vunpack.c.l.b16 %v1484_v22 }
0x115c   :  { %1517 = vmatpush.bf16.xpose.msrb.mxu3 %v1508_v23 }
0x115d   :  { %v1573_v25 = vpack.c.b16 %v1572_v24, %v1572_v24 }
0x115f   :  { %1626 = vrot.lane.b32.xlu0 %v1573_v25, %s2527_s19 }
0x11b2   :  { %v1375_v40 = vpop.xlane.xlu2 %1374 }
0x11b3   :  { %v1379_v42 = vmul.f32 %v1375_v40, %v2706_v3 }
0x11b5   :  { %v1381_v43 = vadd.f32 1e-05, %v1379_v42 }
0x11b7   :  { %2361 = vrsqrt.f32 %v1381_v43  ;;  %vm1389_vm13 = vweird.f32 %v1381_v43 }
0x11ba   :  { %v1378_v47 = vpop.xlane.xlu0 %1377 }
0x11bb   :  { %v1380_v50 = vmul.f32 %v1378_v47, %v2706_v3 }
0x11bd   :  { %v2362_v51 = vpop.eup %2361  ;;  %v1382_v15 = vadd.f32 1e-05, %v1380_v50 }
0x11be   :  { %v1384_v52 = vmul.f32 %v2362_v51, %v1381_v43  ;;  %vm1390_vm12 = vweird.f32 %v2362_v51 }
0x11bf   :  { %2363 = vrsqrt.f32 %v1382_v15  ;;  %vm1391_vm14 = vmor %vm1389_vm13, %vm1390_vm12  ;;  %vm1399_vm4 = vweird.f32 %v1382_v15 }
0x11c0   :  { %v1385_v53 = vmul.f32 %v2362_v51, %v1384_v52 }
0x11c2   :  { %v1386_v54 = vmul.f32 0.5, %v1385_v53 }
0x11c4   :  { %v1387_v48 = vsub.f32 1.5, %v1386_v54 }
0x11c5   :  { %v2364_v55 = vpop.eup %2363 }
0x11c6   :  { %v1388_v56 = vmul.f32 %v2362_v51, %v1387_v48  ;;  %v1394_v39 = vmul.f32 %v2364_v55, %v1382_v15  ;;  %vm1400_vm15 = vweird.f32 %v2364_v55 }
0x11c7   :  { %vm1401_vm6 = vmor %vm1399_vm4, %vm1400_vm15 }
0x11c8   :  { %v1392_v58 = vsel %vm1391_vm14, %v2362_v51, %v1388_v56  ;;  %v1395_v49 = vmul.f32 %v2364_v55, %v1394_v39 }
0x11c9   :  { %v1403_v59 = vmul.f32 %v1392_v58, %v1369_v29  ;;  %v1601_v37 = vpop.permute.xlu1 %1600 }
0x11ca   :  { %v1396_v57 = vmul.f32 0.5, %v1395_v49  ;;  %v1606_v32 = vsel %vm162_vm1, %v1601_v37, 0 }
0x11cb   :  { %v1406_v0 = vmul.f32 %v1405_v2, %v1403_v59  ;;  %1615 = vmatpush.bf16.xpose.msrb.mxu2 %v1606_v32 }
0x11cc   :  { %v1397_v60 = vsub.f32 1.5, %v1396_v57 }
0x11cd   :  { %v1409_v6 = vadd.f32 %v1408_v63, %v1406_v0 }
0x11ce   :  { %v1398_v61 = vmul.f32 %v2364_v55, %v1397_v60 }
0x11cf   :  { %v2948_v9 = vmul.f32 %v1409_v6, %v2735_v45 }
0x11d0   :  { %v1402_v1 = vsel %vm1401_vm6, %v2364_v55, %v1398_v61 }
0x11d1   :  { %v1404_v4 = vmul.f32 %v1402_v1, %v1370_v35  ;;  %v1627_v38 = vpop.permute.xlu0 %1626 }
0x11d2   :  { %v1632_v40 = vsel %vm162_vm1, %v1627_v38, 0 }
0x11d3   :  { %v1407_v7 = vmul.f32 %v1405_v2, %v1404_v4  ;;  %1641 = vmatpush.bf16.xpose.msra.mxu3 %v1632_v40 }
0x11d5   :  { %v1410_v8 = vadd.f32 %v1408_v63, %v1407_v7 }
0x11d7   :  { %v2951_v10 = vmul.f32 %v1410_v8, %v2737_v46 }
0x11d9   :  { %v1418_v11 = vpack.c.bf16 %v2951_v10, %v2948_v9 }
0x11db   :  { %2149 = vmatmul.msk.bf16.vlgmr.msra.gmra.mxu0 %vm137_vm0, %v1418_v11 }
0x1258   :  { %v1444_v5 = vpop.f32.mrf.mxu0 }
0x1259   :  { %v1445_v27 = vadd.f32 %v1444_v5, %v1419_v26 }
0x125b   :  { %v1481_v28 = vpack.c.bf16 %v1445_v27, %v1445_v27 }
0x125d   :  { %v1596_v29 = vunpack.c.l.b16 %v1481_v28  ;;  %2163 = vmatmul.msk.bf16.vlgmr.msra.gmra.mxu2 %vm162_vm1, %v1481_v28 }
0x125f   :  { %v1597_v30 = vpack.c.b16 %v1596_v29, %v1596_v29 }
0x1260   :  { %v1446_v33 = vpop.f32.mrf.mxu0 }
0x1261   :  { %v1447_v34 = vadd.f32 %v1446_v33, %v1419_v26  ;;  %1598 = vrot.lane.b32.xlu2 %v1597_v30, %s2527_s19 }
0x1263   :  { %v1482_v31 = vpack.c.bf16 %v1447_v34, %v1447_v34 }
0x1265   :  { %v1622_v35 = vunpack.c.l.b16 %v1482_v31  ;;  %2164 = vmatmul.msk.bf16.vlgmr.msrb.gmra.mxu3 %vm162_vm1, %v1482_v31 }
0x1267   :  { %v1623_v36 = vpack.c.b16 %v1622_v35, %v1622_v35 }
0x1269   :  { %1624 = vrot.lane.b32.xlu0 %v1623_v36, %s2527_s19 }
0x12bb   :  { %v1599_v41 = vpop.permute.xlu2 %1598 }
0x12bc   :  { %2167 = vmatmul.msk.bf16.vlgmr.msrb.gmra.mxu2 %vm162_vm1, %v1599_v41 }
0x12db   :  { %v1625_v42 = vpop.permute.xlu0 %1624 }
0x12dc   :  { %2168 = vmatmul.msk.bf16.vlgmr.msra.gmra.mxu3 %vm162_vm1, %v1625_v42 }
0x12e0   :  { %v1500_v43 = vpop.f32.mrf.mxu2 }
0x12e1   :  { %v1523_v44 = vsel %vm206_vm2, %v1500_v43, -inf }
0x12e2   :  { %1524 = vmax.xlane.f32.xlu1 %v1523_v44 }
0x12e8   :  { %v1502_v47 = vpop.f32.mrf.mxu2  ;;  %v1519_v50 = vpop.f32.mrf.mxu3 }
0x12e9   :  { %v1526_v51 = vsel %vm206_vm2, %v1519_v50, -inf  ;;  %v2252_v47 = vld [vmem:[%s3074_s8 + $0x18] sm:$0xff] }
0x12ea   :  { %1527 = vmax.xlane.f32.xlu0 %v1526_v51  ;;  %1751 = vmatpush.bf16.msra.mxu2 %v2252_v47 }
0x12f0   :  { %v1521_v15 = vpop.f32.mrf.mxu3 }
0x12fe   :  { %1574 = vrot.lane.b32.xlu0 %v1573_v25, %s2529_s21 }
0x133f   :  { %v1617_v52 = vpop.f32.mrf.mxu2 }
0x1340   :  { %v1647_v53 = vsel %vm206_vm2, %v1617_v52, -inf }
0x1341   :  { %1648 = vmax.xlane.f32.xlu2 %v1647_v53 }
0x1347   :  { %v1619_v54 = vpop.f32.mrf.mxu2 }
0x1348   :  { %v2251_v54 = vld [vmem:[%s3074_s8 + $0x10] sm:$0xff] }
0x1349   :  { %1752 = vmatpush.bf16.msra.mxu2 %v2251_v54  ;;  %v2257_v54 = vld [vmem:[%s3076_s10 + $0x30] sm:$0xff] }
0x1355   :  { %v1525_v48 = vpop.xlane.xlu1 %1524 }
0x1356   :  { %v1529_v55 = vsub.f32 %v1500_v43, %v1525_v48 }
0x1358   :  { %v1531_v56 = vmul.f32 1.442695, %v1529_v55 }
0x1359   :  { %1550 = vrot.lane.b32.xlu2 %v2958_v20, %s2529_s21 }
0x135a   :  { %2365 = vpow2.f32 %v1531_v56 }
0x135d   :  { %v1528_v39 = vpop.xlane.xlu0 %1527 }
0x135e   :  { %v1530_v58 = vsub.f32 %v1519_v50, %v1528_v39 }
0x135f   :  { %v1643_v49 = vpop.f32.mrf.mxu3 }
0x1360   :  { %v2366_v57 = vpop.eup %2365  ;;  %v1533_v2 = vmul.f32 1.442695, %v1530_v58  ;;  %v1650_v59 = vsel %vm206_vm2, %v1643_v49, -inf }
0x1361   :  { %1651 = vmax.xlane.f32.xlu1 %v1650_v59  ;;  %v1535_v60 = vsel %vm206_vm2, %v2366_v57, 0.0 }
0x1362   :  { %2367 = vpow2.f32 %v1533_v2  ;;  %1536 = vadd.xlane.f32.xlu0 %v1535_v60 }
0x1367   :  { %v1645_v61 = vpop.f32.mrf.mxu3 }
0x1368   :  { %v2368_v63 = vpop.eup %2367 }
0x1369   :  { %v1538_v0 = vsel %vm206_vm2, %v2368_v63, 0.0 }
0x136a   :  { %1539 = vadd.xlane.f32.xlu1 %v1538_v0 }
0x1370   :  { %v1575_v1 = vpop.permute.xlu0 %1574 }
0x1371   :  { %v1580_v4 = vsel %vm236_vm3, %v1575_v1, 0 }
0x1372   :  { %1589 = vmatpush.bf16.msrb.mxu1 %v1580_v4 }
0x1376   :  { %1692 = vrot.lane.b32.xlu0 %v1573_v25, %s2528_s20 }
0x13b4   :  { %v1649_v6 = vpop.xlane.xlu2 %1648 }
0x13b5   :  { %v1653_v7 = vsub.f32 %v1617_v52, %v1649_v6 }
0x13b7   :  { %v1655_v8 = vmul.f32 1.442695, %v1653_v7 }
0x13b9   :  { %2369 = vpow2.f32 %v1655_v8 }
0x13bc   :  { %v1551_v11 = vpop.permute.xlu2 %1550 }
0x13bd   :  { %v1556_v12 = vsel %vm236_vm3, %v1551_v11, 0 }
0x13be   :  { %1565 = vmatpush.bf16.msrb.mxu0 %v1556_v12 }
0x13bf   :  { %v2370_v13 = vpop.eup %2369 }
0x13c0   :  { %v1659_v14 = vsel %vm206_vm2, %v2370_v13, 0.0 }
0x13c1   :  { %1660 = vadd.xlane.f32.xlu1 %v1659_v14 }
0x13d4   :  { %v1652_v16 = vpop.xlane.xlu1 %1651 }
0x13d5   :  { %v1654_v17 = vsub.f32 %v1643_v49, %v1652_v16  ;;  %v1537_v19 = vpop.xlane.xlu0 %1536 }
0x13d6   :  { %2371 = vrcp.f32 %v1537_v19  ;;  %v2254_v19 = vld [vmem:[#allocation8 + $0x18] sm:$0xff] }
0x13d7   :  { %v1657_v62 = vmul.f32 1.442695, %v1654_v17  ;;  %1841 = vmatpush.bf16.msrb.mxu3 %v2254_v19 }
0x13d9   :  { %2373 = vpow2.f32 %v1657_v62 }
0x13dc   :  { %v2372_v21 = vpop.eup %2371 }
0x13dd   :  { %v1543_v22 = vmul.f32 %v2372_v21, %v2366_v57  ;;  %v1540_v23 = vpop.xlane.xlu1 %1539  ;;  %v1729_v57 = vperm.slane %v2866_v18, 6 }
0x13de   :  { %2375 = vrcp.f32 %v1540_v23 }
0x13df   :  { %v2374_v24 = vpop.eup %2373  ;;  %v1545_v25 = vpack.c.bf16 %v1543_v22, %v1543_v22  ;;  %v2253_v22 = vld [vmem:[#allocation8 + $0x10] sm:$0xff] }
0x13e0   :  { %v1662_v26 = vsel %vm206_vm2, %v2374_v24, 0.0  ;;  %1842 = vmatpush.bf16.msrb.mxu3 %v2253_v22 }
0x13e1   :  { %1663 = vadd.xlane.f32.xlu1 %v1662_v26  ;;  %2165 = vmatmul.msk.bf16.vlgmr.msrb.gmra.mxu0 %vm206_vm2, %v1545_v25 }
0x13e4   :  { %v2376_v5 = vpop.eup %2375 }
0x13e5   :  { %v1544_v27 = vmul.f32 %v2376_v5, %v2368_v63 }
0x13e7   :  { %v1546_v28 = vpack.c.bf16 %v1544_v27, %v1544_v27 }
0x13e8   :  { %v1693_v29 = vpop.permute.xlu0 %1692 }
0x13e9   :  { %v1698_v30 = vsel %vm236_vm3, %v1693_v29, 0  ;;  %2166 = vmatmul.msk.bf16.vlgmr.msrb.gmra.mxu1 %vm206_vm2, %v1546_v28 }
0x13ea   :  { %1707 = vmatpush.bf16.msra.mxu1 %v1698_v30 }
0x13fa   :  { %1671 = vrot.lane.b32.xlu1 %v2958_v20, %s2528_s20 }
0x1434   :  { %v1661_v33 = vpop.xlane.xlu1 %1660 }
0x1454   :  { %v1664_v34 = vpop.xlane.xlu1 %1663 }
0x1455   :  { %2377 = vrcp.f32 %v1664_v34 }
0x1456   :  { %2379 = vrcp.f32 %v1661_v33 }
0x145b   :  { %v2378_v31 = vpop.eup %2377 }
0x145c   :  { %v1668_v35 = vmul.f32 %v2378_v31, %v2374_v24  ;;  %v2380_v40 = vpop.eup %2379 }
0x145d   :  { %v1667_v41 = vmul.f32 %v2380_v40, %v2370_v13 }
0x145e   :  { %v1670_v36 = vpack.c.bf16 %v1668_v35, %v1668_v35  ;;  %v1567_v37 = vpop.f32.mrf.mxu0 }
0x145f   :  { %v1669_v20 = vpack.c.bf16 %v1667_v41, %v1667_v41 }
0x1460   :  { %2170 = vmatmul.msk.bf16.vlgmr.msra.gmra.mxu1 %vm206_vm2, %v1670_v36 }
0x1466   :  { %v1569_v32 = vpop.f32.mrf.mxu0  ;;  %v1591_v38 = vpop.f32.mrf.mxu1 }
0x146c   :  { %v1672_v42 = vpop.permute.xlu1 %1671 }
0x146d   :  { %v1677_v43 = vsel %vm236_vm3, %v1672_v42, 0 }
0x146e   :  { %v1593_v44 = vpop.f32.mrf.mxu1  ;;  %1686 = vmatpush.bf16.msra.mxu0 %v1677_v43 }
0x1471   :  { %2169 = vmatmul.msk.bf16.vlgmr.msra.gmra.mxu0 %vm206_vm2, %v1669_v20 }
0x14dd   :  { %v1709_v50 = vpop.f32.mrf.mxu1 }
0x14e5   :  { %v1711_v51 = vpop.f32.mrf.mxu1 }
0x14ee   :  { %v1688_v15 = vpop.f32.mrf.mxu0 }
0x14ef   :  { %v2294_v52 = vpack.i.bf16 %v1709_v50, %v1688_v15 }
0x14f1   :  { %2295 = vrot.lane.b32.xlu2 %v2294_v52, %s2531_s23 }
0x14f6   :  { %v1690_v53 = vpop.f32.mrf.mxu0 }
0x14f7   :  { %v2258_v53 = vld [vmem:[%s3076_s10 + $0x38] sm:$0xff] }
0x14f8   :  { %1893 = vmatpush.bf16.msrb.mxu0 %v2258_v53 }
0x14fc   :  { %1894 = vmatpush.bf16.msrb.mxu0 %v2257_v54 }
0x154b   :  { %v2296_v48 = vpop.permute.xlu2 %2295 }
0x154c   :  { %v2298_v55 = vunpack.i.h.bf16 %v2296_v48  ;;  %v2297_v56 = vunpack.i.l.bf16 %v2296_v48  ;;  %v2256_v48 = vld [vmem:[%s3076_s10 + $0x28] sm:$0xff] }
0x154d   :  { %1895 = vmatpush.bf16.msrb.mxu0 %v2256_v48 }
0x154e   :  { %v1722_v39 = vsel %vm162_vm1, %v1591_v38, %v2298_v55  ;;  %v1721_v58 = vsel %vm162_vm1, %v1567_v37, %v2297_v56  ;;  %v1805_v37 = vperm.slane %v2866_v18, 7  ;;  %v3020_v38 = vld [vmem:[%s3077_s11 + $0x18] sm:$0x1f]  ;;  %v2255_v55 = vld [vmem:[%s3076_s10 + $0x20] sm:$0xff] }
0x154f   :  { %v1728_v49 = vpack.c.bf16 %v1722_v39, %v1721_v58  ;;  %v1808_v42 = vperm.slane %v3020_v38, 0  ;;  %v1819_v39 = vperm.slane %v3020_v38, 1 }
0x1551   :  { %2183 = vmatmul.msk.bf16.vlgmr.msra.gmra.mxu2 %vm137_vm0, %v1728_v49  ;;  %1896 = vmatpush.bf16.msrb.mxu0 %v2255_v55 }
0x15d4   :  { %v1754_v2 = vpop.f32.mrf.mxu2 }
0x15d5   :  { %v1755_v59 = vadd.f32 %v1754_v2, %v1729_v57 }
0x15d7   :  { %v1759_v60 = vadd.f32 %v1755_v59, %v2948_v9 }
0x15d9   :  { %v1761_v61 = vsel %vm137_vm0, %v1759_v60, 0.0 }
0x15da   :  { %1762 = vadd.xlane.f32.xlu0 %v1761_v61  ;;  %v1861_v61 = vperm.slane %v3020_v38, 2 }
0x15dc   :  { %v1756_v63 = vpop.f32.mrf.mxu2 }
0x15dd   :  { %v1757_v0 = vadd.f32 %v1756_v63, %v1729_v57 }
0x15df   :  { %v1760_v1 = vadd.f32 %v1757_v0, %v2951_v10 }
0x15e1   :  { %v1764_v4 = vsel %vm137_vm0, %v1760_v1, 0.0 }
0x15e2   :  { %1765 = vadd.xlane.f32.xlu2 %v1764_v4 }
0x164d   :  { %v1763_v6 = vpop.xlane.xlu0 %1762 }
0x164e   :  { %v1767_v7 = vmul.f32 %v1763_v6, %v2706_v3 }
0x1650   :  { %v1769_v8 = vsub.f32 %v1759_v60, %v1767_v7 }
0x1652   :  { %v1771_v11 = vmul.f32 %v1769_v8, %v1769_v8 }
0x1654   :  { %v1773_v12 = vsel %vm137_vm0, %v1771_v11, 0.0 }
0x1655   :  { %v1766_v13 = vpop.xlane.xlu2 %1765  ;;  %1774 = vadd.xlane.f32.xlu1 %v1773_v12 }
0x1656   :  { %v1768_v9 = vmul.f32 %v1766_v13, %v2706_v3 }
0x1658   :  { %v1770_v14 = vsub.f32 %v1760_v1, %v1768_v9 }
0x165a   :  { %v1772_v16 = vmul.f32 %v1770_v14, %v1770_v14 }
0x165c   :  { %v1776_v17 = vsel %vm137_vm0, %v1772_v16, 0.0 }
0x165d   :  { %1777 = vadd.xlane.f32.xlu0 %v1776_v17 }
0x16c8   :  { %v1775_v10 = vpop.xlane.xlu1 %1774 }
0x16c9   :  { %v1779_v62 = vmul.f32 %v1775_v10, %v2706_v3 }
0x16cb   :  { %v1781_v21 = vadd.f32 1e-05, %v1779_v62 }
0x16cd   :  { %2381 = vrsqrt.f32 %v1781_v21  ;;  %vm1789_vm2 = vweird.f32 %v1781_v21 }
0x16d0   :  { %v1778_v23 = vpop.xlane.xlu0 %1777 }
0x16d1   :  { %v1780_v24 = vmul.f32 %v1778_v23, %v2706_v3  ;;  %v2260_v23 = vld [vmem:[%s3078_s12 + $0x8] sm:$0xff] }
0x16d2   :  { %1983 = vmatpush.bf16.msrb.mxu1 %v2260_v23 }
0x16d3   :  { %v2382_v25 = vpop.eup %2381  ;;  %v1782_v26 = vadd.f32 1e-05, %v1780_v24 }
0x16d4   :  { %v1784_v5 = vmul.f32 %v2382_v25, %v1781_v21  ;;  %vm1790_vm1 = vweird.f32 %v2382_v25 }
0x16d5   :  { %2383 = vrsqrt.f32 %v1782_v26  ;;  %vm1791_vm3 = vmor %vm1789_vm2, %vm1790_vm1  ;;  %vm1799_vm8 = vweird.f32 %v1782_v26 }
0x16d6   :  { %v1785_v27 = vmul.f32 %v2382_v25, %v1784_v5 }
0x16d8   :  { %v1786_v28 = vmul.f32 0.5, %v1785_v27 }
0x16da   :  { %v1787_v29 = vsub.f32 1.5, %v1786_v28 }
0x16db   :  { %v2384_v30 = vpop.eup %2383 }
0x16dc   :  { %v1788_v33 = vmul.f32 %v2382_v25, %v1787_v29  ;;  %v1794_v34 = vmul.f32 %v2384_v30, %v1782_v26  ;;  %vm1800_vm7 = vweird.f32 %v2384_v30  ;;  %v2259_v26 = vld [vmem:[%s3078_s12] sm:$0xff]  ;;  %s2534_s12 = smov [#allocation10]  }
0x16dd   :  { %vm1801_vm9 = vmor %vm1799_vm8, %vm1800_vm7  ;;  %1984 = vmatpush.bf16.msrb.mxu1 %v2259_v26  ;;  %s1997_s29 = sshll.u32 %s2534_s12, 4  ;;  %s1998_s29 = int_to_ptr.vmem [resolvable:$true] %s1997_s29 }
0x16de   :  { %v1792_v31 = vsel %vm1791_vm3, %v2382_v25, %v1788_v33  ;;  %v1795_v35 = vmul.f32 %v2384_v30, %v1794_v34 }
0x16df   :  { %v1803_v32 = vmul.f32 %v1792_v31, %v1769_v8 }
0x16e0   :  { %v1796_v36 = vmul.f32 0.5, %v1795_v35 }
0x16e1   :  { %v1806_v43 = vmul.f32 %v1805_v37, %v1803_v32 }
0x16e2   :  { %v1797_v40 = vsub.f32 1.5, %v1796_v36 }
0x16e3   :  { %v1809_v47 = vadd.f32 %v1808_v42, %v1806_v43 }
0x16e4   :  { %v1798_v41 = vmul.f32 %v2384_v30, %v1797_v40 }
0x16e5   :  { %v1811_v18 = vmul.f32 %v1809_v47, %v2735_v45 }
0x16e6   :  { %v1802_v44 = vsel %vm1801_vm9, %v2384_v30, %v1798_v41 }
0x16e7   :  { %v1804_v20 = vmul.f32 %v1802_v44, %v1770_v14 }
0x16e9   :  { %v1807_v50 = vmul.f32 %v1805_v37, %v1804_v20  ;;  %v1952_v20 = vperm.slane %v3020_v38, 4 }
0x16eb   :  { %v1810_v51 = vadd.f32 %v1808_v42, %v1807_v50  ;;  %v1949_v42 = vperm.slane %v3020_v38, 3 }
0x16ed   :  { %v1812_v15 = vmul.f32 %v1810_v51, %v2737_v46 }
0x16ef   :  { %v1818_v52 = vpack.c.bf16 %v1812_v15, %v1811_v18 }
0x16f1   :  { %2192 = vmatmul.msk.bf16.vlgmr.msrb.gmra.mxu3 %vm137_vm0, %v1818_v52 }
0x1774   :  { %v1844_v56 = vpop.f32.mrf.mxu3 }
0x1775   :  { %v1845_v58 = vadd.f32 %v1844_v56, %v1819_v39 }
0x1777   :  { %v1849_v2 = vmax.f32 %v1845_v58, 0.0 }
0x177c   :  { %v1846_v49 = vpop.f32.mrf.mxu3 }
0x177d   :  { %v1847_v57 = vadd.f32 %v1846_v49, %v1819_v39 }
0x177f   :  { %v1850_v59 = vmax.f32 %v1847_v57, 0.0 }
0x1781   :  { %v1860_v60 = vpack.c.bf16 %v1850_v59, %v1849_v2 }
0x1783   :  { %2217 = vmatmul.msk.bf16.vlgmr.msrb.gmra.mxu0 %vm974_vm5, %v1860_v60 }
0x1800   :  { %v1898_v63 = vpop.f32.mrf.mxu0 }
0x1801   :  { %v1899_v0 = vadd.f32 %v1898_v63, %v1861_v61 }
0x1803   :  { %v1903_v1 = vadd.f32 %v1899_v0, %v1811_v18 }
0x1805   :  { %v1905_v4 = vsel %vm137_vm0, %v1903_v1, 0.0 }
0x1806   :  { %1906 = vadd.xlane.f32.xlu2 %v1905_v4 }
0x1808   :  { %v1900_v6 = vpop.f32.mrf.mxu0 }
0x1809   :  { %v1901_v7 = vadd.f32 %v1900_v6, %v1861_v61 }
0x180b   :  { %v1904_v8 = vadd.f32 %v1901_v7, %v1812_v15 }
0x180d   :  { %v1908_v11 = vsel %vm137_vm0, %v1904_v8, 0.0 }
0x180e   :  { %1909 = vadd.xlane.f32.xlu0 %v1908_v11 }
0x1879   :  { %v1907_v12 = vpop.xlane.xlu2 %1906 }
0x187a   :  { %v1911_v13 = vmul.f32 %v1907_v12, %v2706_v3 }
0x187c   :  { %v1913_v9 = vsub.f32 %v1903_v1, %v1911_v13 }
0x187e   :  { %v1915_v14 = vmul.f32 %v1913_v9, %v1913_v9 }
0x1880   :  { %v1917_v16 = vsel %vm137_vm0, %v1915_v14, 0.0 }
0x1881   :  { %v1910_v17 = vpop.xlane.xlu0 %1909  ;;  %1918 = vadd.xlane.f32.xlu2 %v1917_v16 }
0x1882   :  { %v1912_v10 = vmul.f32 %v1910_v17, %v2706_v3 }
0x1884   :  { %v1914_v19 = vsub.f32 %v1904_v8, %v1912_v10 }
0x1886   :  { %v1916_v62 = vmul.f32 %v1914_v19, %v1914_v19 }
0x1888   :  { %v1920_v21 = vsel %vm137_vm0, %v1916_v62, 0.0 }
0x1889   :  { %1921 = vadd.xlane.f32.xlu1 %v1920_v21 }
0x18f4   :  { %v1919_v22 = vpop.xlane.xlu2 %1918 }
0x18f5   :  { %v1923_v24 = vmul.f32 %v1919_v22, %v2706_v3 }
0x18f7   :  { %v1925_v25 = vadd.f32 1e-05, %v1923_v24 }
0x18f9   :  { %2385 = vrsqrt.f32 %v1925_v25  ;;  %vm1933_vm10 = vweird.f32 %v1925_v25 }
0x18fc   :  { %v1922_v5 = vpop.xlane.xlu1 %1921 }
0x18fd   :  { %v1924_v27 = vmul.f32 %v1922_v5, %v2706_v3 }
0x18ff   :  { %v2386_v28 = vpop.eup %2385  ;;  %v1926_v29 = vadd.f32 1e-05, %v1924_v27 }
0x1900   :  { %v1928_v30 = vmul.f32 %v2386_v28, %v1925_v25  ;;  %vm1934_vm5 = vweird.f32 %v2386_v28 }
0x1901   :  { %2387 = vrsqrt.f32 %v1926_v29  ;;  %vm1935_vm11 = vmor %vm1933_vm10, %vm1934_vm5  ;;  %vm1943_vm13 = vweird.f32 %v1926_v29 }
0x1902   :  { %v1929_v33 = vmul.f32 %v2386_v28, %v1928_v30 }
0x1904   :  { %v1930_v34 = vmul.f32 0.5, %v1929_v33 }
0x1906   :  { %v1931_v31 = vsub.f32 1.5, %v1930_v34 }
0x1907   :  { %v2388_v35 = vpop.eup %2387 }
0x1908   :  { %v1932_v36 = vmul.f32 %v2386_v28, %v1931_v31  ;;  %v1938_v37 = vmul.f32 %v2388_v35, %v1926_v29  ;;  %vm1944_vm12 = vweird.f32 %v2388_v35 }
0x1909   :  { %vm1945_vm14 = vmor %vm1943_vm13, %vm1944_vm12 }
0x190a   :  { %v1936_v32 = vsel %vm1935_vm11, %v2386_v28, %v1932_v36  ;;  %v1939_v40 = vmul.f32 %v2388_v35, %v1938_v37 }
0x190b   :  { %v1947_v43 = vmul.f32 %v1936_v32, %v1913_v9 }
0x190c   :  { %v1940_v41 = vmul.f32 0.5, %v1939_v40 }
0x190d   :  { %v1950_v47 = vmul.f32 %v1949_v42, %v1947_v43 }
0x190e   :  { %v1941_v3 = vsub.f32 1.5, %v1940_v41 }
0x190f   :  { %v1953_v18 = vadd.f32 %v1952_v20, %v1950_v47 }
0x1910   :  { %v1942_v44 = vmul.f32 %v2388_v35, %v1941_v3 }
0x1911   :  { %v1955_v53 = vmul.f32 %v1953_v18, %v2735_v45 }
0x1912   :  { %v1946_v50 = vsel %vm1945_vm14, %v2388_v35, %v1942_v44 }
0x1913   :  { %v1948_v51 = vmul.f32 %v1946_v50, %v1914_v19 }
0x1915   :  { %v1951_v15 = vmul.f32 %v1949_v42, %v1948_v51 }
0x1917   :  { %v1954_v52 = vadd.f32 %v1952_v20, %v1951_v15 }
0x1919   :  { %v1956_v54 = vmul.f32 %v1954_v52, %v2737_v46 }
0x191b   :  { %v1961_v48 = vpack.c.bf16 %v1956_v54, %v1955_v53 }
0x191d   :  { %2226 = vmatmul.msk.bf16.vlgmr.msrb.gmra.mxu1 %vm137_vm0, %v1961_v48 }
0x199a   :  { %v1986_v55 = vpop.f32.mrf.mxu1 }
0x199b   :  { %1991 = vst [vmem:[#allocation10] sm:$0xff] %v1986_v55 }
0x19a2   :  { %v1988_v38 = vpop.f32.mrf.mxu1 }
0x19a3   :  { %1992 = vst [vmem:[#allocation10 + $0x8] sm:$0xff] %v1988_v38 }
0x19a4   :  { %2005 = dma.vmem_to_hbm [thread:$0]  %s1998_s29, 256, %s2000_s14, [#allocation4], %s2520_s16, %s2520_s16, %s2521_s17  }
0x19a5   :  { %2517 = dma.done.wait [#allocation4], 256  }
0x19a6   :  { %2518 = vsyncadd [#allocation4], 4294967040 }
0x19a7   :  { %2010 = vsyncpa [#allocation3], 1 }
0x19a8   :  { %2011 = vsyncpa [#allocation6], 1 }
0x19a9   :  { %2012 = vsyncpa [#allocation9], 1 }
0x19aa   :  { %2013 = vsyncpa [#allocation4], 1 }

</bundles_post_ra>
